<compile_context>
chip_gen: v7x
topology: tpu7x:2x2x1
jax: 0.10.0
libtpu: 0.0.40
codegen_flags: <defaults>
</compile_context>

<pallas_src>
import functools

import jax
import jax.numpy as jnp
from jax import lax
from jax.experimental import pallas as pl
from jax.experimental.pallas import tpu as pltpu


def _bilstm_kernel(x_ref,                       # (T, B, F)   bf16
                   wih_ref,                     # (F, 8H)     bf16  [fwd | bwd] packed
                   b_ref,                       # (1, 8H)     f32   [fwd | bwd] packed (b_ih + b_hh)
                   whh_f_ref, whh_b_ref,        # (H, 4H)     bf16
                   wout_f_ref, wout_b_ref,      # (H, O)      bf16  (split output Linear)
                   bout_ref,                    # (1, O)      f32
                   out_ref,                     # (T, B, O)   f32
                   gxf_scratch, gxb_scratch,    # (T, B, 4H)  f32   precomputed input gates
                   *, unroll):
    T, B, F = x_ref.shape
    H = whh_f_ref.shape[0]
    G = 4 * H
    O = out_ref.shape[-1]

    # ---- (opt 1 + 6) ONE big input-projection GEMM for both directions,
    #      biases folded in once, stored per-direction for full-width loop reads.
    x2 = x_ref[...].reshape(T * B, F)
    gx = jnp.dot(x2, wih_ref[...], preferred_element_type=jnp.float32)      # (T*B, 8H)
    gx = gx + b_ref[...]
    gxf_scratch[...] = gx[:, :G].reshape(T, B, G)
    gxb_scratch[...] = gx[:, G:].reshape(T, B, G)

    # ---- (opt 2) output accumulates the fused Linear contributions of both
    #      directions; init to zero, bias is added with the forward contribution.
    out_ref[...] = jnp.zeros((T, B, O), jnp.float32)

    whh_f = whh_f_ref[...]
    whh_b = whh_b_ref[...]
    wout_f = wout_f_ref[...]
    wout_b = wout_b_ref[...]
    bout = bout_ref[...]
    cdt = whh_f.dtype                             # MXU operand dtype (bf16)

    def cell(gx_t, h, c, whh):
        # Only the recurrent dot remains on the per-step critical path.
        gates = gx_t + jnp.dot(h.astype(cdt), whh,
                               preferred_element_type=jnp.float32)
        # PyTorch gate order: i, f, g, o (f32 gate math, f32 cell state).
        i = jax.nn.sigmoid(gates[:, 0:H])
        f = jax.nn.sigmoid(gates[:, H:2 * H])
        g = jnp.tanh(gates[:, 2 * H:3 * H])
        o = jax.nn.sigmoid(gates[:, 3 * H:4 * H])
        c_new = f * c + i * g
        h_new = o * jnp.tanh(c_new)
        return h_new, c_new

    zeros = jnp.zeros((B, H), jnp.float32)

    # ---- (opt 3) merged forward/backward recurrence: both recurrent dots and
    #      both (off-critical-path) output dots issue every iteration.
    def body(s, carry):
        h_f, c_f, h_b, c_b = carry
        tb = T - 1 - s
        h_f, c_f = cell(gxf_scratch[s], h_f, c_f, whh_f)
        h_b, c_b = cell(gxb_scratch[tb], h_b, c_b, whh_b)
        out_ref[s] = out_ref[s] + (
            jnp.dot(h_f.astype(cdt), wout_f, preferred_element_type=jnp.float32)
            + bout)
        out_ref[tb] = out_ref[tb] + jnp.dot(
            h_b.astype(cdt), wout_b, preferred_element_type=jnp.float32)
        return (h_f, c_f, h_b, c_b)

    # (opt 7) unrolled loop so the scheduler sees across iterations.
    lax.fori_loop(0, T, body, (zeros, zeros, zeros, zeros), unroll=unroll)


def bidirectional_lstm(x, p, *, compute_dtype=jnp.bfloat16, unroll=True):
    """x: (T, B, F) float32.  p: dict with PyTorch-shaped parameters."""
    T, B, F = x.shape
    H = p["w_hh_f"].shape[1]
    O = p["w_out"].shape[0]
    cd = compute_dtype

    # Glue: pre-transpose, pack both directions' input weights into one (F, 8H)
    # matrix, fold the two LSTM biases, split the output Linear per direction.
    wih = jnp.concatenate([p["w_ih_f"].T, p["w_ih_b"].T], axis=1).astype(cd)   # (F, 8H)
    b_packed = jnp.concatenate(
        [p["b_ih_f"] + p["b_hh_f"], p["b_ih_b"] + p["b_hh_b"]]
    ).reshape(1, 8 * H).astype(jnp.float32)
    whh_f = p["w_hh_f"].T.astype(cd)                                           # (H, 4H)
    whh_b = p["w_hh_b"].T.astype(cd)
    wout_f = p["w_out"][:, :H].T.astype(cd)                                    # (H, O)
    wout_b = p["w_out"][:, H:].T.astype(cd)                                    # (H, O)
    bout = p["b_out"].reshape(1, O).astype(jnp.float32)
    x_c = x.astype(cd)

    vmem = pl.BlockSpec(memory_space=pltpu.MemorySpace.VMEM)
    kernel = functools.partial(_bilstm_kernel, unroll=unroll)
    return pl.pallas_call(
        kernel,
        out_shape=jax.ShapeDtypeStruct((T, B, O), jnp.float32),
        in_specs=[vmem] * 8,
        out_specs=vmem,
        scratch_shapes=[pltpu.VMEM((T, B, 4 * H), jnp.float32),
                        pltpu.VMEM((T, B, 4 * H), jnp.float32)],
        compiler_params=pltpu.CompilerParams(
            vmem_limit_bytes=48 * 1024 * 1024),
    )(x_c, wih, b_packed, whh_f, whh_b, wout_f, wout_b, bout)


# ---------------- references (for correctness checks) -----------------------
def _ref_bilstm_f32(x, p):
    """Pure-f32 PyTorch-semantics reference."""
    T, B, F = x.shape
    H = p["w_hh_f"].shape[1]

    def run(x_seq, wih, whh, bih, bhh):
        wih_t, whh_t, b = wih.T, whh.T, bih + bhh

        def step(carry, x_t):
            h, c = carry
            g = x_t @ wih_t + h @ whh_t + b
            i = jax.nn.sigmoid(g[:, :H])
            f = jax.nn.sigmoid(g[:, H:2 * H])
            gg = jnp.tanh(g[:, 2 * H:3 * H])
            o = jax.nn.sigmoid(g[:, 3 * H:])
            c = f * c + i * gg
            h = o * jnp.tanh(c)
            return (h, c), h

        init = (jnp.zeros((B, H), jnp.float32), jnp.zeros((B, H), jnp.float32))
        _, hs = lax.scan(step, init, x_seq)
        return hs

    h_fwd = run(x, p["w_ih_f"], p["w_hh_f"], p["b_ih_f"], p["b_hh_f"])
    h_bwd = run(x[::-1], p["w_ih_b"], p["w_hh_b"], p["b_ih_b"], p["b_hh_b"])[::-1]
    rec = jnp.concatenate([h_fwd, h_bwd], axis=-1)
    out = rec.reshape(T * B, 2 * H) @ p["w_out"].T + p["b_out"]
    return out.reshape(T, B, -1)


def _ref_bilstm_mixed(x, p, compute_dtype=jnp.bfloat16):
    """Reference mirroring the kernel's numerics: bf16 MXU operands, f32 accumulation."""
    T, B, F = x.shape
    H = p["w_hh_f"].shape[1]
    cd = compute_dtype

    wih = jnp.concatenate([p["w_ih_f"].T, p["w_ih_b"].T], axis=1).astype(cd)
    b = jnp.concatenate([p["b_ih_f"] + p["b_hh_f"],
                         p["b_ih_b"] + p["b_hh_b"]]).reshape(1, 8 * H)
    gx = jnp.dot(x.astype(cd).reshape(T * B, F), wih,
                 preferred_element_type=jnp.float32) + b
    gx = gx.reshape(T, B, 8 * H)
    gxf, gxb = gx[..., :4 * H], gx[..., 4 * H:]

    def run(gx_seq, whh):
        whh_c = whh.T.astype(cd)

        def step(carry, g_x):
            h, c = carry
            g = g_x + jnp.dot(h.astype(cd), whh_c, preferred_element_type=jnp.float32)
            i = jax.nn.sigmoid(g[:, :H])
            f = jax.nn.sigmoid(g[:, H:2 * H])
            gg = jnp.tanh(g[:, 2 * H:3 * H])
            o = jax.nn.sigmoid(g[:, 3 * H:])
            c = f * c + i * gg
            h = o * jnp.tanh(c)
            return (h, c), h

        init = (jnp.zeros((B, H), jnp.float32), jnp.zeros((B, H), jnp.float32))
        _, hs = lax.scan(step, init, gx_seq)
        return hs

    hf = run(gxf, p["w_hh_f"])
    hb = run(gxb[::-1], p["w_hh_b"])[::-1]
    wout_f = p["w_out"][:, :H].T.astype(cd)
    wout_b = p["w_out"][:, H:].T.astype(cd)
    out = (jnp.dot(hf.astype(cd).reshape(T * B, H), wout_f,
                   preferred_element_type=jnp.float32)
           + jnp.dot(hb.astype(cd).reshape(T * B, H), wout_b,
                     preferred_element_type=jnp.float32)
           + p["b_out"].reshape(1, -1))
    return out.reshape(T, B, -1)


def _init_params(key, num_features, hidden_size, output_size):
    H, F, O = hidden_size, num_features, output_size
    k_lstm = 1.0 / jnp.sqrt(H)
    k_lin = 1.0 / jnp.sqrt(2.0 * H)
    keys = jax.random.split(key, 10)
    u = lambda k, shape, s: jax.random.uniform(k, shape, jnp.float32, -s, s)
    return {
        "w_ih_f": u(keys[0], (4 * H, F), k_lstm),
        "w_hh_f": u(keys[1], (4 * H, H), k_lstm),
        "b_ih_f": u(keys[2], (4 * H,), k_lstm),
        "b_hh_f": u(keys[3], (4 * H,), k_lstm),
        "w_ih_b": u(keys[4], (4 * H, F), k_lstm),
        "w_hh_b": u(keys[5], (4 * H, H), k_lstm),
        "b_ih_b": u(keys[6], (4 * H,), k_lstm),
        "b_hh_b": u(keys[7], (4 * H,), k_lstm),
        "w_out": u(keys[8], (O, 2 * H), k_lin),
        "b_out": u(keys[9], (O,), k_lin),
    }


if __name__ == "__main__":
    T, B, F, H, O = 8, 2, 16, 32, 12
    key = jax.random.PRNGKey(0)
    k_x, k_p = jax.random.split(key)

    x = jax.random.normal(k_x, (T, B, F), jnp.float32)
    params = _init_params(k_p, F, H, O)

    out = bidirectional_lstm(x, params)
    out = jax.block_until_ready(out)
    assert out.shape == (T, B, O), out.shape

    # Tight check vs a reference using identical numerics (bf16 MXU operands).
    ref_mixed = _ref_bilstm_mixed(x, params)
    assert jnp.allclose(out, ref_mixed, atol=1e-3, rtol=1e-3), \
        float(jnp.max(jnp.abs(out - ref_mixed)))

    # Looser check vs the pure-f32 PyTorch-semantics reference.
    ref_f32 = _ref_bilstm_f32(x, params)
    assert jnp.allclose(out, ref_f32, atol=3e-2, rtol=3e-2), \
        float(jnp.max(jnp.abs(out - ref_f32)))

    print("KERNEL_OK")
</pallas_src>

<mosaic_0001>
module attributes {stable_mosaic.version = 11 : i64} {
  func.func @_bilstm_kernel(%arg0: memref<8x2x16xbf16, #tpu.memory_space<vmem>>, %arg1: memref<16x256xbf16, #tpu.memory_space<vmem>>, %arg2: memref<1x256xf32, #tpu.memory_space<vmem>>, %arg3: memref<32x128xbf16, #tpu.memory_space<vmem>>, %arg4: memref<32x128xbf16, #tpu.memory_space<vmem>>, %arg5: memref<32x12xbf16, #tpu.memory_space<vmem>>, %arg6: memref<32x12xbf16, #tpu.memory_space<vmem>>, %arg7: memref<1x12xf32, #tpu.memory_space<vmem>>, %arg8: memref<8x2x12xf32, #tpu.memory_space<vmem>>, %arg9: memref<8x2x128xf32, #tpu.memory_space<vmem>>, %arg10: memref<8x2x128xf32, #tpu.memory_space<vmem>>) attributes {dimension_semantics = [], scalar_prefetch = 0 : i64, scratch_operands = 2 : i64, tpu.core_type = #tpu.core_type<tc>} {
    %c0 = arith.constant 0 : index
    %c0_0 = arith.constant 0 : index
    %c0_1 = arith.constant 0 : index
    %0 = vector.load %arg0[%c0, %c0_0, %c0_1] : memref<8x2x16xbf16, #tpu.memory_space<vmem>>, vector<8x2x16xbf16>
    %1 = vector.shape_cast %0 : vector<8x2x16xbf16> to vector<16x16xbf16>
    %c0_2 = arith.constant 0 : index
    %c0_3 = arith.constant 0 : index
    %2 = vector.load %arg1[%c0_2, %c0_3] : memref<16x256xbf16, #tpu.memory_space<vmem>>, vector<16x256xbf16>
    %cst = arith.constant dense<0.000000e+00> : vector<16x256xf32>
    %3 = tpu.matmul %1, %2, %cst {dimension_numbers = #tpu.dot_dimension_numbers<[1], [0], [0], [1], [0, 0, 1, 1], [], []>} : vector<16x16xbf16>, vector<16x256xbf16>, vector<16x256xf32> -> vector<16x256xf32>
    %c0_4 = arith.constant 0 : index
    %c0_5 = arith.constant 0 : index
    %4 = vector.load %arg2[%c0_4, %c0_5] : memref<1x256xf32, #tpu.memory_space<vmem>>, vector<1x256xf32>
    %5 = vector.broadcast %4 : vector<1x256xf32> to vector<16x256xf32>
    %6 = arith.addf %3, %5 : vector<16x256xf32>
    %7 = vector.extract_strided_slice %6 {offsets = [0, 0], sizes = [16, 128], strides = [1, 1]} : vector<16x256xf32> to vector<16x128xf32>
    %8 = vector.shape_cast %7 : vector<16x128xf32> to vector<8x2x128xf32>
    %c0_6 = arith.constant 0 : index
    %c0_7 = arith.constant 0 : index
    %c0_8 = arith.constant 0 : index
    %9 = vector.load %arg9[%c0_6, %c0_7, %c0_8] : memref<8x2x128xf32, #tpu.memory_space<vmem>>, vector<8x2x128xf32>
    tpu.vector_store %arg9[%c0_6, %c0_7, %c0_8], %8 {strides = array<i32>} : memref<8x2x128xf32, #tpu.memory_space<vmem>>, vector<8x2x128xf32>,
    %10 = vector.extract_strided_slice %6 {offsets = [0, 128], sizes = [16, 128], strides = [1, 1]} : vector<16x256xf32> to vector<16x128xf32>
    %11 = vector.shape_cast %10 : vector<16x128xf32> to vector<8x2x128xf32>
    %c0_9 = arith.constant 0 : index
    %c0_10 = arith.constant 0 : index
    %c0_11 = arith.constant 0 : index
    %12 = vector.load %arg10[%c0_9, %c0_10, %c0_11] : memref<8x2x128xf32, #tpu.memory_space<vmem>>, vector<8x2x128xf32>
    tpu.vector_store %arg10[%c0_9, %c0_10, %c0_11], %11 {strides = array<i32>} : memref<8x2x128xf32, #tpu.memory_space<vmem>>, vector<8x2x128xf32>,
    %cst_12 = arith.constant 0.000000e+00 : f32
    %13 = vector.broadcast %cst_12 : f32 to vector<8x2x12xf32>
    %c0_13 = arith.constant 0 : index
    %c0_14 = arith.constant 0 : index
    %c0_15 = arith.constant 0 : index
    %14 = vector.load %arg8[%c0_13, %c0_14, %c0_15] : memref<8x2x12xf32, #tpu.memory_space<vmem>>, vector<8x2x12xf32>
    tpu.vector_store %arg8[%c0_13, %c0_14, %c0_15], %13 {strides = array<i32>} : memref<8x2x12xf32, #tpu.memory_space<vmem>>, vector<8x2x12xf32>,
    %c0_16 = arith.constant 0 : index
    %c0_17 = arith.constant 0 : index
    %15 = vector.load %arg3[%c0_16, %c0_17] : memref<32x128xbf16, #tpu.memory_space<vmem>>, vector<32x128xbf16>
    %c0_18 = arith.constant 0 : index
    %c0_19 = arith.constant 0 : index
    %16 = vector.load %arg4[%c0_18, %c0_19] : memref<32x128xbf16, #tpu.memory_space<vmem>>, vector<32x128xbf16>
    %c0_20 = arith.constant 0 : index
    %c0_21 = arith.constant 0 : index
    %17 = vector.load %arg5[%c0_20, %c0_21] : memref<32x12xbf16, #tpu.memory_space<vmem>>, vector<32x12xbf16>
    %c0_22 = arith.constant 0 : index
    %c0_23 = arith.constant 0 : index
    %18 = vector.load %arg6[%c0_22, %c0_23] : memref<32x12xbf16, #tpu.memory_space<vmem>>, vector<32x12xbf16>
    %c0_24 = arith.constant 0 : index
    %c0_25 = arith.constant 0 : index
    %19 = vector.load %arg7[%c0_24, %c0_25] : memref<1x12xf32, #tpu.memory_space<vmem>>, vector<1x12xf32>
    %cst_26 = arith.constant 0.000000e+00 : f32
    %20 = vector.broadcast %cst_26 : f32 to vector<2x32xf32>
    %c0_i32 = arith.constant 0 : i32
    %c7_i32 = arith.constant 7 : i32
    %21 = arith.subi %c7_i32, %c0_i32 : i32
    %22 = arith.index_cast %c0_i32 : i32 to index
    %c0_27 = arith.constant 0 : index
    %c0_28 = arith.constant 0 : index
    %23 = vector.load %arg9[%22, %c0_27, %c0_28] : memref<8x2x128xf32, #tpu.memory_space<vmem>>, vector<1x2x128xf32>
    %24 = vector.shape_cast %23 : vector<1x2x128xf32> to vector<2x128xf32>
    %25 = arith.truncf %20 : vector<2x32xf32> to vector<2x32xbf16>
    %cst_29 = arith.constant dense<0.000000e+00> : vector<2x128xf32>
    %26 = tpu.matmul %25, %15, %cst_29 {dimension_numbers = #tpu.dot_dimension_numbers<[1], [0], [0], [1], [0, 0, 1, 1], [], []>} : vector<2x32xbf16>, vector<32x128xbf16>, vector<2x128xf32> -> vector<2x128xf32>
    %27 = arith.addf %24, %26 : vector<2x128xf32>
    %28 = vector.extract_strided_slice %27 {offsets = [0, 0], sizes = [2, 32], strides = [1, 1]} : vector<2x128xf32> to vector<2x32xf32>
    %29 = arith.negf %28 : vector<2x32xf32>
    %30 = math.exp %29 : vector<2x32xf32>
    %cst_30 = arith.constant 1.000000e+00 : f32
    %31 = vector.broadcast %cst_30 : f32 to vector<2x32xf32>
    %32 = arith.addf %31, %30 : vector<2x32xf32>
    %33 = arith.divf %31, %32 : vector<2x32xf32>
    %34 = vector.extract_strided_slice %27 {offsets = [0, 32], sizes = [2, 32], strides = [1, 1]} : vector<2x128xf32> to vector<2x32xf32>
    %35 = arith.negf %34 : vector<2x32xf32>
    %36 = math.exp %35 : vector<2x32xf32>
    %cst_31 = arith.constant 1.000000e+00 : f32
    %37 = vector.broadcast %cst_31 : f32 to vector<2x32xf32>
    %38 = arith.addf %37, %36 : vector<2x32xf32>
    %39 = arith.divf %37, %38 : vector<2x32xf32>
    %40 = vector.extract_strided_slice %27 {offsets = [0, 64], sizes = [2, 32], strides = [1, 1]} : vector<2x128xf32> to vector<2x32xf32>
    %41 = math.tanh %40 : vector<2x32xf32>
    %42 = vector.extract_strided_slice %27 {offsets = [0, 96], sizes = [2, 32], strides = [1, 1]} : vector<2x128xf32> to vector<2x32xf32>
    %43 = arith.negf %42 : vector<2x32xf32>
    %44 = math.exp %43 : vector<2x32xf32>
    %cst_32 = arith.constant 1.000000e+00 : f32
    %45 = vector.broadcast %cst_32 : f32 to vector<2x32xf32>
    %46 = arith.addf %45, %44 : vector<2x32xf32>
    %47 = arith.divf %45, %46 : vector<2x32xf32>
    %48 = arith.mulf %39, %20 : vector<2x32xf32>
    %49 = arith.mulf %33, %41 : vector<2x32xf32>
    %50 = arith.addf %48, %49 : vector<2x32xf32>
    %51 = math.tanh %50 : vector<2x32xf32>
    %52 = arith.mulf %47, %51 : vector<2x32xf32>
    %53 = arith.index_cast %21 : i32 to index
    %c0_33 = arith.constant 0 : index
    %c0_34 = arith.constant 0 : index
    %54 = vector.load %arg10[%53, %c0_33, %c0_34] : memref<8x2x128xf32, #tpu.memory_space<vmem>>, vector<1x2x128xf32>
    %55 = vector.shape_cast %54 : vector<1x2x128xf32> to vector<2x128xf32>
    %56 = arith.truncf %20 : vector<2x32xf32> to vector<2x32xbf16>
    %cst_35 = arith.constant dense<0.000000e+00> : vector<2x128xf32>
    %57 = tpu.matmul %56, %16, %cst_35 {dimension_numbers = #tpu.dot_dimension_numbers<[1], [0], [0], [1], [0, 0, 1, 1], [], []>} : vector<2x32xbf16>, vector<32x128xbf16>, vector<2x128xf32> -> vector<2x128xf32>
    %58 = arith.addf %55, %57 : vector<2x128xf32>
    %59 = vector.extract_strided_slice %58 {offsets = [0, 0], sizes = [2, 32], strides = [1, 1]} : vector<2x128xf32> to vector<2x32xf32>
    %60 = arith.negf %59 : vector<2x32xf32>
    %61 = math.exp %60 : vector<2x32xf32>
    %cst_36 = arith.constant 1.000000e+00 : f32
    %62 = vector.broadcast %cst_36 : f32 to vector<2x32xf32>
    %63 = arith.addf %62, %61 : vector<2x32xf32>
    %64 = arith.divf %62, %63 : vector<2x32xf32>
    %65 = vector.extract_strided_slice %58 {offsets = [0, 32], sizes = [2, 32], strides = [1, 1]} : vector<2x128xf32> to vector<2x32xf32>
    %66 = arith.negf %65 : vector<2x32xf32>
    %67 = math.exp %66 : vector<2x32xf32>
    %cst_37 = arith.constant 1.000000e+00 : f32
    %68 = vector.broadcast %cst_37 : f32 to vector<2x32xf32>
    %69 = arith.addf %68, %67 : vector<2x32xf32>
    %70 = arith.divf %68, %69 : vector<2x32xf32>
    %71 = vector.extract_strided_slice %58 {offsets = [0, 64], sizes = [2, 32], strides = [1, 1]} : vector<2x128xf32> to vector<2x32xf32>
    %72 = math.tanh %71 : vector<2x32xf32>
    %73 = vector.extract_strided_slice %58 {offsets = [0, 96], sizes = [2, 32], strides = [1, 1]} : vector<2x128xf32> to vector<2x32xf32>
    %74 = arith.negf %73 : vector<2x32xf32>
    %75 = math.exp %74 : vector<2x32xf32>
    %cst_38 = arith.constant 1.000000e+00 : f32
    %76 = vector.broadcast %cst_38 : f32 to vector<2x32xf32>
    %77 = arith.addf %76, %75 : vector<2x32xf32>
    %78 = arith.divf %76, %77 : vector<2x32xf32>
    %79 = arith.mulf %70, %20 : vector<2x32xf32>
    %80 = arith.mulf %64, %72 : vector<2x32xf32>
    %81 = arith.addf %79, %80 : vector<2x32xf32>
    %82 = math.tanh %81 : vector<2x32xf32>
    %83 = arith.mulf %78, %82 : vector<2x32xf32>
    %84 = arith.index_cast %c0_i32 : i32 to index
    %c0_39 = arith.constant 0 : index
    %c0_40 = arith.constant 0 : index
    %85 = vector.load %arg8[%84, %c0_39, %c0_40] : memref<8x2x12xf32, #tpu.memory_space<vmem>>, vector<1x2x12xf32>
    %86 = vector.shape_cast %85 : vector<1x2x12xf32> to vector<2x12xf32>
    %87 = arith.truncf %52 : vector<2x32xf32> to vector<2x32xbf16>
    %cst_41 = arith.constant dense<0.000000e+00> : vector<2x12xf32>
    %88 = tpu.matmul %87, %17, %cst_41 {dimension_numbers = #tpu.dot_dimension_numbers<[1], [0], [0], [1], [0, 0, 1, 1], [], []>} : vector<2x32xbf16>, vector<32x12xbf16>, vector<2x12xf32> -> vector<2x12xf32>
    %89 = vector.broadcast %19 : vector<1x12xf32> to vector<2x12xf32>
    %90 = arith.addf %88, %89 : vector<2x12xf32>
    %91 = arith.addf %86, %90 : vector<2x12xf32>
    %92 = arith.index_cast %c0_i32 : i32 to index
    %c0_42 = arith.constant 0 : index
    %c0_43 = arith.constant 0 : index
    %93 = vector.load %arg8[%92, %c0_42, %c0_43] : memref<8x2x12xf32, #tpu.memory_space<vmem>>, vector<1x2x12xf32>
    %94 = vector.shape_cast %93 : vector<1x2x12xf32> to vector<2x12xf32>
    %95 = vector.shape_cast %91 : vector<2x12xf32> to vector<1x2x12xf32>
    tpu.vector_store %arg8[%92, %c0_42, %c0_43], %95 {strides = array<i32>} : memref<8x2x12xf32, #tpu.memory_space<vmem>>, vector<1x2x12xf32>,
    %96 = arith.index_cast %21 : i32 to index
    %c0_44 = arith.constant 0 : index
    %c0_45 = arith.constant 0 : index
    %97 = vector.load %arg8[%96, %c0_44, %c0_45] : memref<8x2x12xf32, #tpu.memory_space<vmem>>, vector<1x2x12xf32>
    %98 = vector.shape_cast %97 : vector<1x2x12xf32> to vector<2x12xf32>
    %99 = arith.truncf %83 : vector<2x32xf32> to vector<2x32xbf16>
    %cst_46 = arith.constant dense<0.000000e+00> : vector<2x12xf32>
    %100 = tpu.matmul %99, %18, %cst_46 {dimension_numbers = #tpu.dot_dimension_numbers<[1], [0], [0], [1], [0, 0, 1, 1], [], []>} : vector<2x32xbf16>, vector<32x12xbf16>, vector<2x12xf32> -> vector<2x12xf32>
    %101 = arith.addf %98, %100 : vector<2x12xf32>
    %102 = arith.index_cast %21 : i32 to index
    %c0_47 = arith.constant 0 : index
    %c0_48 = arith.constant 0 : index
    %103 = vector.load %arg8[%102, %c0_47, %c0_48] : memref<8x2x12xf32, #tpu.memory_space<vmem>>, vector<1x2x12xf32>
    %104 = vector.shape_cast %103 : vector<1x2x12xf32> to vector<2x12xf32>
    %105 = vector.shape_cast %101 : vector<2x12xf32> to vector<1x2x12xf32>
    tpu.vector_store %arg8[%102, %c0_47, %c0_48], %105 {strides = array<i32>} : memref<8x2x12xf32, #tpu.memory_space<vmem>>, vector<1x2x12xf32>,
    %c1_i32 = arith.constant 1 : i32
    %c7_i32_49 = arith.constant 7 : i32
    %106 = arith.subi %c7_i32_49, %c1_i32 : i32
    %107 = arith.index_cast %c1_i32 : i32 to index
    %c0_50 = arith.constant 0 : index
    %c0_51 = arith.constant 0 : index
    %108 = vector.load %arg9[%107, %c0_50, %c0_51] : memref<8x2x128xf32, #tpu.memory_space<vmem>>, vector<1x2x128xf32>
    %109 = vector.shape_cast %108 : vector<1x2x128xf32> to vector<2x128xf32>
    %110 = arith.truncf %52 : vector<2x32xf32> to vector<2x32xbf16>
    %cst_52 = arith.constant dense<0.000000e+00> : vector<2x128xf32>
    %111 = tpu.matmul %110, %15, %cst_52 {dimension_numbers = #tpu.dot_dimension_numbers<[1], [0], [0], [1], [0, 0, 1, 1], [], []>} : vector<2x32xbf16>, vector<32x128xbf16>, vector<2x128xf32> -> vector<2x128xf32>
    %112 = arith.addf %109, %111 : vector<2x128xf32>
    %113 = vector.extract_strided_slice %112 {offsets = [0, 0], sizes = [2, 32], strides = [1, 1]} : vector<2x128xf32> to vector<2x32xf32>
    %114 = arith.negf %113 : vector<2x32xf32>
    %115 = math.exp %114 : vector<2x32xf32>
    %cst_53 = arith.constant 1.000000e+00 : f32
    %116 = vector.broadcast %cst_53 : f32 to vector<2x32xf32>
    %117 = arith.addf %116, %115 : vector<2x32xf32>
    %118 = arith.divf %116, %117 : vector<2x32xf32>
    %119 = vector.extract_strided_slice %112 {offsets = [0, 32], sizes = [2, 32], strides = [1, 1]} : vector<2x128xf32> to vector<2x32xf32>
    %120 = arith.negf %119 : vector<2x32xf32>
    %121 = math.exp %120 : vector<2x32xf32>
    %cst_54 = arith.constant 1.000000e+00 : f32
    %122 = vector.broadcast %cst_54 : f32 to vector<2x32xf32>
    %123 = arith.addf %122, %121 : vector<2x32xf32>
    %124 = arith.divf %122, %123 : vector<2x32xf32>
    %125 = vector.extract_strided_slice %112 {offsets = [0, 64], sizes = [2, 32], strides = [1, 1]} : vector<2x128xf32> to vector<2x32xf32>
    %126 = math.tanh %125 : vector<2x32xf32>
    %127 = vector.extract_strided_slice %112 {offsets = [0, 96], sizes = [2, 32], strides = [1, 1]} : vector<2x128xf32> to vector<2x32xf32>
    %128 = arith.negf %127 : vector<2x32xf32>
    %129 = math.exp %128 : vector<2x32xf32>
    %cst_55 = arith.constant 1.000000e+00 : f32
    %130 = vector.broadcast %cst_55 : f32 to vector<2x32xf32>
    %131 = arith.addf %130, %129 : vector<2x32xf32>
    %132 = arith.divf %130, %131 : vector<2x32xf32>
    %133 = arith.mulf %124, %50 : vector<2x32xf32>
    %134 = arith.mulf %118, %126 : vector<2x32xf32>
    %135 = arith.addf %133, %134 : vector<2x32xf32>
    %136 = math.tanh %135 : vector<2x32xf32>
    %137 = arith.mulf %132, %136 : vector<2x32xf32>
    %138 = arith.index_cast %106 : i32 to index
    %c0_56 = arith.constant 0 : index
    %c0_57 = arith.constant 0 : index
    %139 = vector.load %arg10[%138, %c0_56, %c0_57] : memref<8x2x128xf32, #tpu.memory_space<vmem>>, vector<1x2x128xf32>
    %140 = vector.shape_cast %139 : vector<1x2x128xf32> to vector<2x128xf32>
    %141 = arith.truncf %83 : vector<2x32xf32> to vector<2x32xbf16>
    %cst_58 = arith.constant dense<0.000000e+00> : vector<2x128xf32>
    %142 = tpu.matmul %141, %16, %cst_58 {dimension_numbers = #tpu.dot_dimension_numbers<[1], [0], [0], [1], [0, 0, 1, 1], [], []>} : vector<2x32xbf16>, vector<32x128xbf16>, vector<2x128xf32> -> vector<2x128xf32>
    %143 = arith.addf %140, %142 : vector<2x128xf32>
    %144 = vector.extract_strided_slice %143 {offsets = [0, 0], sizes = [2, 32], strides = [1, 1]} : vector<2x128xf32> to vector<2x32xf32>
    %145 = arith.negf %144 : vector<2x32xf32>
    %146 = math.exp %145 : vector<2x32xf32>
    %cst_59 = arith.constant 1.000000e+00 : f32
    %147 = vector.broadcast %cst_59 : f32 to vector<2x32xf32>
    %148 = arith.addf %147, %146 : vector<2x32xf32>
    %149 = arith.divf %147, %148 : vector<2x32xf32>
    %150 = vector.extract_strided_slice %143 {offsets = [0, 32], sizes = [2, 32], strides = [1, 1]} : vector<2x128xf32> to vector<2x32xf32>
    %151 = arith.negf %150 : vector<2x32xf32>
    %152 = math.exp %151 : vector<2x32xf32>
    %cst_60 = arith.constant 1.000000e+00 : f32
    %153 = vector.broadcast %cst_60 : f32 to vector<2x32xf32>
    %154 = arith.addf %153, %152 : vector<2x32xf32>
    %155 = arith.divf %153, %154 : vector<2x32xf32>
    %156 = vector.extract_strided_slice %143 {offsets = [0, 64], sizes = [2, 32], strides = [1, 1]} : vector<2x128xf32> to vector<2x32xf32>
    %157 = math.tanh %156 : vector<2x32xf32>
    %158 = vector.extract_strided_slice %143 {offsets = [0, 96], sizes = [2, 32], strides = [1, 1]} : vector<2x128xf32> to vector<2x32xf32>
    %159 = arith.negf %158 : vector<2x32xf32>
    %160 = math.exp %159 : vector<2x32xf32>
    %cst_61 = arith.constant 1.000000e+00 : f32
    %161 = vector.broadcast %cst_61 : f32 to vector<2x32xf32>
    %162 = arith.addf %161, %160 : vector<2x32xf32>
    %163 = arith.divf %161, %162 : vector<2x32xf32>
    %164 = arith.mulf %155, %81 : vector<2x32xf32>
    %165 = arith.mulf %149, %157 : vector<2x32xf32>
    %166 = arith.addf %164, %165 : vector<2x32xf32>
    %167 = math.tanh %166 : vector<2x32xf32>
    %168 = arith.mulf %163, %167 : vector<2x32xf32>
    %169 = arith.index_cast %c1_i32 : i32 to index
    %c0_62 = arith.constant 0 : index
    %c0_63 = arith.constant 0 : index
    %170 = vector.load %arg8[%169, %c0_62, %c0_63] : memref<8x2x12xf32, #tpu.memory_space<vmem>>, vector<1x2x12xf32>
    %171 = vector.shape_cast %170 : vector<1x2x12xf32> to vector<2x12xf32>
    %172 = arith.truncf %137 : vector<2x32xf32> to vector<2x32xbf16>
    %cst_64 = arith.constant dense<0.000000e+00> : vector<2x12xf32>
    %173 = tpu.matmul %172, %17, %cst_64 {dimension_numbers = #tpu.dot_dimension_numbers<[1], [0], [0], [1], [0, 0, 1, 1], [], []>} : vector<2x32xbf16>, vector<32x12xbf16>, vector<2x12xf32> -> vector<2x12xf32>
    %174 = vector.broadcast %19 : vector<1x12xf32> to vector<2x12xf32>
    %175 = arith.addf %173, %174 : vector<2x12xf32>
    %176 = arith.addf %171, %175 : vector<2x12xf32>
    %177 = arith.index_cast %c1_i32 : i32 to index
    %c0_65 = arith.constant 0 : index
    %c0_66 = arith.constant 0 : index
    %178 = vector.load %arg8[%177, %c0_65, %c0_66] : memref<8x2x12xf32, #tpu.memory_space<vmem>>, vector<1x2x12xf32>
    %179 = vector.shape_cast %178 : vector<1x2x12xf32> to vector<2x12xf32>
    %180 = vector.shape_cast %176 : vector<2x12xf32> to vector<1x2x12xf32>
    tpu.vector_store %arg8[%177, %c0_65, %c0_66], %180 {strides = array<i32>} : memref<8x2x12xf32, #tpu.memory_space<vmem>>, vector<1x2x12xf32>,
    %181 = arith.index_cast %106 : i32 to index
    %c0_67 = arith.constant 0 : index
    %c0_68 = arith.constant 0 : index
    %182 = vector.load %arg8[%181, %c0_67, %c0_68] : memref<8x2x12xf32, #tpu.memory_space<vmem>>, vector<1x2x12xf32>
    %183 = vector.shape_cast %182 : vector<1x2x12xf32> to vector<2x12xf32>
    %184 = arith.truncf %168 : vector<2x32xf32> to vector<2x32xbf16>
    %cst_69 = arith.constant dense<0.000000e+00> : vector<2x12xf32>
    %185 = tpu.matmul %184, %18, %cst_69 {dimension_numbers = #tpu.dot_dimension_numbers<[1], [0], [0], [1], [0, 0, 1, 1], [], []>} : vector<2x32xbf16>, vector<32x12xbf16>, vector<2x12xf32> -> vector<2x12xf32>
    %186 = arith.addf %183, %185 : vector<2x12xf32>
    %187 = arith.index_cast %106 : i32 to index
    %c0_70 = arith.constant 0 : index
    %c0_71 = arith.constant 0 : index
    %188 = vector.load %arg8[%187, %c0_70, %c0_71] : memref<8x2x12xf32, #tpu.memory_space<vmem>>, vector<1x2x12xf32>
    %189 = vector.shape_cast %188 : vector<1x2x12xf32> to vector<2x12xf32>
    %190 = vector.shape_cast %186 : vector<2x12xf32> to vector<1x2x12xf32>
    tpu.vector_store %arg8[%187, %c0_70, %c0_71], %190 {strides = array<i32>} : memref<8x2x12xf32, #tpu.memory_space<vmem>>, vector<1x2x12xf32>,
    %c2_i32 = arith.constant 2 : i32
    %c7_i32_72 = arith.constant 7 : i32
    %191 = arith.subi %c7_i32_72, %c2_i32 : i32
    %192 = arith.index_cast %c2_i32 : i32 to index
    %c0_73 = arith.constant 0 : index
    %c0_74 = arith.constant 0 : index
    %193 = vector.load %arg9[%192, %c0_73, %c0_74] : memref<8x2x128xf32, #tpu.memory_space<vmem>>, vector<1x2x128xf32>
    %194 = vector.shape_cast %193 : vector<1x2x128xf32> to vector<2x128xf32>
    %195 = arith.truncf %137 : vector<2x32xf32> to vector<2x32xbf16>
    %cst_75 = arith.constant dense<0.000000e+00> : vector<2x128xf32>
    %196 = tpu.matmul %195, %15, %cst_75 {dimension_numbers = #tpu.dot_dimension_numbers<[1], [0], [0], [1], [0, 0, 1, 1], [], []>} : vector<2x32xbf16>, vector<32x128xbf16>, vector<2x128xf32> -> vector<2x128xf32>
    %197 = arith.addf %194, %196 : vector<2x128xf32>
    %198 = vector.extract_strided_slice %197 {offsets = [0, 0], sizes = [2, 32], strides = [1, 1]} : vector<2x128xf32> to vector<2x32xf32>
    %199 = arith.negf %198 : vector<2x32xf32>
    %200 = math.exp %199 : vector<2x32xf32>
    %cst_76 = arith.constant 1.000000e+00 : f32
    %201 = vector.broadcast %cst_76 : f32 to vector<2x32xf32>
    %202 = arith.addf %201, %200 : vector<2x32xf32>
    %203 = arith.divf %201, %202 : vector<2x32xf32>
    %204 = vector.extract_strided_slice %197 {offsets = [0, 32], sizes = [2, 32], strides = [1, 1]} : vector<2x128xf32> to vector<2x32xf32>
    %205 = arith.negf %204 : vector<2x32xf32>
    %206 = math.exp %205 : vector<2x32xf32>
    %cst_77 = arith.constant 1.000000e+00 : f32
    %207 = vector.broadcast %cst_77 : f32 to vector<2x32xf32>
    %208 = arith.addf %207, %206 : vector<2x32xf32>
    %209 = arith.divf %207, %208 : vector<2x32xf32>
    %210 = vector.extract_strided_slice %197 {offsets = [0, 64], sizes = [2, 32], strides = [1, 1]} : vector<2x128xf32> to vector<2x32xf32>
    %211 = math.tanh %210 : vector<2x32xf32>
    %212 = vector.extract_strided_slice %197 {offsets = [0, 96], sizes = [2, 32], strides = [1, 1]} : vector<2x128xf32> to vector<2x32xf32>
    %213 = arith.negf %212 : vector<2x32xf32>
    %214 = math.exp %213 : vector<2x32xf32>
    %cst_78 = arith.constant 1.000000e+00 : f32
    %215 = vector.broadcast %cst_78 : f32 to vector<2x32xf32>
    %216 = arith.addf %215, %214 : vector<2x32xf32>
    %217 = arith.divf %215, %216 : vector<2x32xf32>
    %218 = arith.mulf %209, %135 : vector<2x32xf32>
    %219 = arith.mulf %203, %211 : vector<2x32xf32>
    %220 = arith.addf %218, %219 : vector<2x32xf32>
    %221 = math.tanh %220 : vector<2x32xf32>
    %222 = arith.mulf %217, %221 : vector<2x32xf32>
    %223 = arith.index_cast %191 : i32 to index
    %c0_79 = arith.constant 0 : index
    %c0_80 = arith.constant 0 : index
    %224 = vector.load %arg10[%223, %c0_79, %c0_80] : memref<8x2x128xf32, #tpu.memory_space<vmem>>, vector<1x2x128xf32>
    %225 = vector.shape_cast %224 : vector<1x2x128xf32> to vector<2x128xf32>
    %226 = arith.truncf %168 : vector<2x32xf32> to vector<2x32xbf16>
    %cst_81 = arith.constant dense<0.000000e+00> : vector<2x128xf32>
    %227 = tpu.matmul %226, %16, %cst_81 {dimension_numbers = #tpu.dot_dimension_numbers<[1], [0], [0], [1], [0, 0, 1, 1], [], []>} : vector<2x32xbf16>, vector<32x128xbf16>, vector<2x128xf32> -> vector<2x128xf32>
    %228 = arith.addf %225, %227 : vector<2x128xf32>
    %229 = vector.extract_strided_slice %228 {offsets = [0, 0], sizes = [2, 32], strides = [1, 1]} : vector<2x128xf32> to vector<2x32xf32>
    %230 = arith.negf %229 : vector<2x32xf32>
    %231 = math.exp %230 : vector<2x32xf32>
    %cst_82 = arith.constant 1.000000e+00 : f32
    %232 = vector.broadcast %cst_82 : f32 to vector<2x32xf32>
    %233 = arith.addf %232, %231 : vector<2x32xf32>
    %234 = arith.divf %232, %233 : vector<2x32xf32>
    %235 = vector.extract_strided_slice %228 {offsets = [0, 32], sizes = [2, 32], strides = [1, 1]} : vector<2x128xf32> to vector<2x32xf32>
    %236 = arith.negf %235 : vector<2x32xf32>
    %237 = math.exp %236 : vector<2x32xf32>
    %cst_83 = arith.constant 1.000000e+00 : f32
    %238 = vector.broadcast %cst_83 : f32 to vector<2x32xf32>
    %239 = arith.addf %238, %237 : vector<2x32xf32>
    %240 = arith.divf %238, %239 : vector<2x32xf32>
    %241 = vector.extract_strided_slice %228 {offsets = [0, 64], sizes = [2, 32], strides = [1, 1]} : vector<2x128xf32> to vector<2x32xf32>
    %242 = math.tanh %241 : vector<2x32xf32>
    %243 = vector.extract_strided_slice %228 {offsets = [0, 96], sizes = [2, 32], strides = [1, 1]} : vector<2x128xf32> to vector<2x32xf32>
    %244 = arith.negf %243 : vector<2x32xf32>
    %245 = math.exp %244 : vector<2x32xf32>
    %cst_84 = arith.constant 1.000000e+00 : f32
    %246 = vector.broadcast %cst_84 : f32 to vector<2x32xf32>
    %247 = arith.addf %246, %245 : vector<2x32xf32>
    %248 = arith.divf %246, %247 : vector<2x32xf32>
    %249 = arith.mulf %240, %166 : vector<2x32xf32>
    %250 = arith.mulf %234, %242 : vector<2x32xf32>
    %251 = arith.addf %249, %250 : vector<2x32xf32>
    %252 = math.tanh %251 : vector<2x32xf32>
    %253 = arith.mulf %248, %252 : vector<2x32xf32>
    %254 = arith.index_cast %c2_i32 : i32 to index
    %c0_85 = arith.constant 0 : index
    %c0_86 = arith.constant 0 : index
    %255 = vector.load %arg8[%254, %c0_85, %c0_86] : memref<8x2x12xf32, #tpu.memory_space<vmem>>, vector<1x2x12xf32>
    %256 = vector.shape_cast %255 : vector<1x2x12xf32> to vector<2x12xf32>
    %257 = arith.truncf %222 : vector<2x32xf32> to vector<2x32xbf16>
    %cst_87 = arith.constant dense<0.000000e+00> : vector<2x12xf32>
    %258 = tpu.matmul %257, %17, %cst_87 {dimension_numbers = #tpu.dot_dimension_numbers<[1], [0], [0], [1], [0, 0, 1, 1], [], []>} : vector<2x32xbf16>, vector<32x12xbf16>, vector<2x12xf32> -> vector<2x12xf32>
    %259 = vector.broadcast %19 : vector<1x12xf32> to vector<2x12xf32>
    %260 = arith.addf %258, %259 : vector<2x12xf32>
    %261 = arith.addf %256, %260 : vector<2x12xf32>
    %262 = arith.index_cast %c2_i32 : i32 to index
    %c0_88 = arith.constant 0 : index
    %c0_89 = arith.constant 0 : index
    %263 = vector.load %arg8[%262, %c0_88, %c0_89] : memref<8x2x12xf32, #tpu.memory_space<vmem>>, vector<1x2x12xf32>
    %264 = vector.shape_cast %263 : vector<1x2x12xf32> to vector<2x12xf32>
    %265 = vector.shape_cast %261 : vector<2x12xf32> to vector<1x2x12xf32>
    tpu.vector_store %arg8[%262, %c0_88, %c0_89], %265 {strides = array<i32>} : memref<8x2x12xf32, #tpu.memory_space<vmem>>, vector<1x2x12xf32>,
    %266 = arith.index_cast %191 : i32 to index
    %c0_90 = arith.constant 0 : index
    %c0_91 = arith.constant 0 : index
    %267 = vector.load %arg8[%266, %c0_90, %c0_91] : memref<8x2x12xf32, #tpu.memory_space<vmem>>, vector<1x2x12xf32>
    %268 = vector.shape_cast %267 : vector<1x2x12xf32> to vector<2x12xf32>
    %269 = arith.truncf %253 : vector<2x32xf32> to vector<2x32xbf16>
    %cst_92 = arith.constant dense<0.000000e+00> : vector<2x12xf32>
    %270 = tpu.matmul %269, %18, %cst_92 {dimension_numbers = #tpu.dot_dimension_numbers<[1], [0], [0], [1], [0, 0, 1, 1], [], []>} : vector<2x32xbf16>, vector<32x12xbf16>, vector<2x12xf32> -> vector<2x12xf32>
    %271 = arith.addf %268, %270 : vector<2x12xf32>
    %272 = arith.index_cast %191 : i32 to index
    %c0_93 = arith.constant 0 : index
    %c0_94 = arith.constant 0 : index
    %273 = vector.load %arg8[%272, %c0_93, %c0_94] : memref<8x2x12xf32, #tpu.memory_space<vmem>>, vector<1x2x12xf32>
    %274 = vector.shape_cast %273 : vector<1x2x12xf32> to vector<2x12xf32>
    %275 = vector.shape_cast %271 : vector<2x12xf32> to vector<1x2x12xf32>
    tpu.vector_store %arg8[%272, %c0_93, %c0_94], %275 {strides = array<i32>} : memref<8x2x12xf32, #tpu.memory_space<vmem>>, vector<1x2x12xf32>,
    %c3_i32 = arith.constant 3 : i32
    %c7_i32_95 = arith.constant 7 : i32
    %276 = arith.subi %c7_i32_95, %c3_i32 : i32
    %277 = arith.index_cast %c3_i32 : i32 to index
    %c0_96 = arith.constant 0 : index
    %c0_97 = arith.constant 0 : index
    %278 = vector.load %arg9[%277, %c0_96, %c0_97] : memref<8x2x128xf32, #tpu.memory_space<vmem>>, vector<1x2x128xf32>
    %279 = vector.shape_cast %278 : vector<1x2x128xf32> to vector<2x128xf32>
    %280 = arith.truncf %222 : vector<2x32xf32> to vector<2x32xbf16>
    %cst_98 = arith.constant dense<0.000000e+00> : vector<2x128xf32>
    %281 = tpu.matmul %280, %15, %cst_98 {dimension_numbers = #tpu.dot_dimension_numbers<[1], [0], [0], [1], [0, 0, 1, 1], [], []>} : vector<2x32xbf16>, vector<32x128xbf16>, vector<2x128xf32> -> vector<2x128xf32>
    %282 = arith.addf %279, %281 : vector<2x128xf32>
    %283 = vector.extract_strided_slice %282 {offsets = [0, 0], sizes = [2, 32], strides = [1, 1]} : vector<2x128xf32> to vector<2x32xf32>
    %284 = arith.negf %283 : vector<2x32xf32>
    %285 = math.exp %284 : vector<2x32xf32>
    %cst_99 = arith.constant 1.000000e+00 : f32
    %286 = vector.broadcast %cst_99 : f32 to vector<2x32xf32>
    %287 = arith.addf %286, %285 : vector<2x32xf32>
    %288 = arith.divf %286, %287 : vector<2x32xf32>
    %289 = vector.extract_strided_slice %282 {offsets = [0, 32], sizes = [2, 32], strides = [1, 1]} : vector<2x128xf32> to vector<2x32xf32>
    %290 = arith.negf %289 : vector<2x32xf32>
    %291 = math.exp %290 : vector<2x32xf32>
    %cst_100 = arith.constant 1.000000e+00 : f32
    %292 = vector.broadcast %cst_100 : f32 to vector<2x32xf32>
    %293 = arith.addf %292, %291 : vector<2x32xf32>
    %294 = arith.divf %292, %293 : vector<2x32xf32>
    %295 = vector.extract_strided_slice %282 {offsets = [0, 64], sizes = [2, 32], strides = [1, 1]} : vector<2x128xf32> to vector<2x32xf32>
    %296 = math.tanh %295 : vector<2x32xf32>
    %297 = vector.extract_strided_slice %282 {offsets = [0, 96], sizes = [2, 32], strides = [1, 1]} : vector<2x128xf32> to vector<2x32xf32>
    %298 = arith.negf %297 : vector<2x32xf32>
    %299 = math.exp %298 : vector<2x32xf32>
    %cst_101 = arith.constant 1.000000e+00 : f32
    %300 = vector.broadcast %cst_101 : f32 to vector<2x32xf32>
    %301 = arith.addf %300, %299 : vector<2x32xf32>
    %302 = arith.divf %300, %301 : vector<2x32xf32>
    %303 = arith.mulf %294, %220 : vector<2x32xf32>
    %304 = arith.mulf %288, %296 : vector<2x32xf32>
    %305 = arith.addf %303, %304 : vector<2x32xf32>
    %306 = math.tanh %305 : vector<2x32xf32>
    %307 = arith.mulf %302, %306 : vector<2x32xf32>
    %308 = arith.index_cast %276 : i32 to index
    %c0_102 = arith.constant 0 : index
    %c0_103 = arith.constant 0 : index
    %309 = vector.load %arg10[%308, %c0_102, %c0_103] : memref<8x2x128xf32, #tpu.memory_space<vmem>>, vector<1x2x128xf32>
    %310 = vector.shape_cast %309 : vector<1x2x128xf32> to vector<2x128xf32>
    %311 = arith.truncf %253 : vector<2x32xf32> to vector<2x32xbf16>
    %cst_104 = arith.constant dense<0.000000e+00> : vector<2x128xf32>
    %312 = tpu.matmul %311, %16, %cst_104 {dimension_numbers = #tpu.dot_dimension_numbers<[1], [0], [0], [1], [0, 0, 1, 1], [], []>} : vector<2x32xbf16>, vector<32x128xbf16>, vector<2x128xf32> -> vector<2x128xf32>
    %313 = arith.addf %310, %312 : vector<2x128xf32>
    %314 = vector.extract_strided_slice %313 {offsets = [0, 0], sizes = [2, 32], strides = [1, 1]} : vector<2x128xf32> to vector<2x32xf32>
    %315 = arith.negf %314 : vector<2x32xf32>
    %316 = math.exp %315 : vector<2x32xf32>
    %cst_105 = arith.constant 1.000000e+00 : f32
    %317 = vector.broadcast %cst_105 : f32 to vector<2x32xf32>
    %318 = arith.addf %317, %316 : vector<2x32xf32>
    %319 = arith.divf %317, %318 : vector<2x32xf32>
    %320 = vector.extract_strided_slice %313 {offsets = [0, 32], sizes = [2, 32], strides = [1, 1]} : vector<2x128xf32> to vector<2x32xf32>
    %321 = arith.negf %320 : vector<2x32xf32>
    %322 = math.exp %321 : vector<2x32xf32>
    %cst_106 = arith.constant 1.000000e+00 : f32
    %323 = vector.broadcast %cst_106 : f32 to vector<2x32xf32>
    %324 = arith.addf %323, %322 : vector<2x32xf32>
    %325 = arith.divf %323, %324 : vector<2x32xf32>
    %326 = vector.extract_strided_slice %313 {offsets = [0, 64], sizes = [2, 32], strides = [1, 1]} : vector<2x128xf32> to vector<2x32xf32>
    %327 = math.tanh %326 : vector<2x32xf32>
    %328 = vector.extract_strided_slice %313 {offsets = [0, 96], sizes = [2, 32], strides = [1, 1]} : vector<2x128xf32> to vector<2x32xf32>
    %329 = arith.negf %328 : vector<2x32xf32>
    %330 = math.exp %329 : vector<2x32xf32>
    %cst_107 = arith.constant 1.000000e+00 : f32
    %331 = vector.broadcast %cst_107 : f32 to vector<2x32xf32>
    %332 = arith.addf %331, %330 : vector<2x32xf32>
    %333 = arith.divf %331, %332 : vector<2x32xf32>
    %334 = arith.mulf %325, %251 : vector<2x32xf32>
    %335 = arith.mulf %319, %327 : vector<2x32xf32>
    %336 = arith.addf %334, %335 : vector<2x32xf32>
    %337 = math.tanh %336 : vector<2x32xf32>
    %338 = arith.mulf %333, %337 : vector<2x32xf32>
    %339 = arith.index_cast %c3_i32 : i32 to index
    %c0_108 = arith.constant 0 : index
    %c0_109 = arith.constant 0 : index
    %340 = vector.load %arg8[%339, %c0_108, %c0_109] : memref<8x2x12xf32, #tpu.memory_space<vmem>>, vector<1x2x12xf32>
    %341 = vector.shape_cast %340 : vector<1x2x12xf32> to vector<2x12xf32>
    %342 = arith.truncf %307 : vector<2x32xf32> to vector<2x32xbf16>
    %cst_110 = arith.constant dense<0.000000e+00> : vector<2x12xf32>
    %343 = tpu.matmul %342, %17, %cst_110 {dimension_numbers = #tpu.dot_dimension_numbers<[1], [0], [0], [1], [0, 0, 1, 1], [], []>} : vector<2x32xbf16>, vector<32x12xbf16>, vector<2x12xf32> -> vector<2x12xf32>
    %344 = vector.broadcast %19 : vector<1x12xf32> to vector<2x12xf32>
    %345 = arith.addf %343, %344 : vector<2x12xf32>
    %346 = arith.addf %341, %345 : vector<2x12xf32>
    %347 = arith.index_cast %c3_i32 : i32 to index
    %c0_111 = arith.constant 0 : index
    %c0_112 = arith.constant 0 : index
    %348 = vector.load %arg8[%347, %c0_111, %c0_112] : memref<8x2x12xf32, #tpu.memory_space<vmem>>, vector<1x2x12xf32>
    %349 = vector.shape_cast %348 : vector<1x2x12xf32> to vector<2x12xf32>
    %350 = vector.shape_cast %346 : vector<2x12xf32> to vector<1x2x12xf32>
    tpu.vector_store %arg8[%347, %c0_111, %c0_112], %350 {strides = array<i32>} : memref<8x2x12xf32, #tpu.memory_space<vmem>>, vector<1x2x12xf32>,
    %351 = arith.index_cast %276 : i32 to index
    %c0_113 = arith.constant 0 : index
    %c0_114 = arith.constant 0 : index
    %352 = vector.load %arg8[%351, %c0_113, %c0_114] : memref<8x2x12xf32, #tpu.memory_space<vmem>>, vector<1x2x12xf32>
    %353 = vector.shape_cast %352 : vector<1x2x12xf32> to vector<2x12xf32>
    %354 = arith.truncf %338 : vector<2x32xf32> to vector<2x32xbf16>
    %cst_115 = arith.constant dense<0.000000e+00> : vector<2x12xf32>
    %355 = tpu.matmul %354, %18, %cst_115 {dimension_numbers = #tpu.dot_dimension_numbers<[1], [0], [0], [1], [0, 0, 1, 1], [], []>} : vector<2x32xbf16>, vector<32x12xbf16>, vector<2x12xf32> -> vector<2x12xf32>
    %356 = arith.addf %353, %355 : vector<2x12xf32>
    %357 = arith.index_cast %276 : i32 to index
    %c0_116 = arith.constant 0 : index
    %c0_117 = arith.constant 0 : index
    %358 = vector.load %arg8[%357, %c0_116, %c0_117] : memref<8x2x12xf32, #tpu.memory_space<vmem>>, vector<1x2x12xf32>
    %359 = vector.shape_cast %358 : vector<1x2x12xf32> to vector<2x12xf32>
    %360 = vector.shape_cast %356 : vector<2x12xf32> to vector<1x2x12xf32>
    tpu.vector_store %arg8[%357, %c0_116, %c0_117], %360 {strides = array<i32>} : memref<8x2x12xf32, #tpu.memory_space<vmem>>, vector<1x2x12xf32>,
    %c4_i32 = arith.constant 4 : i32
    %c7_i32_118 = arith.constant 7 : i32
    %361 = arith.subi %c7_i32_118, %c4_i32 : i32
    %362 = arith.index_cast %c4_i32 : i32 to index
    %c0_119 = arith.constant 0 : index
    %c0_120 = arith.constant 0 : index
    %363 = vector.load %arg9[%362, %c0_119, %c0_120] : memref<8x2x128xf32, #tpu.memory_space<vmem>>, vector<1x2x128xf32>
    %364 = vector.shape_cast %363 : vector<1x2x128xf32> to vector<2x128xf32>
    %365 = arith.truncf %307 : vector<2x32xf32> to vector<2x32xbf16>
    %cst_121 = arith.constant dense<0.000000e+00> : vector<2x128xf32>
    %366 = tpu.matmul %365, %15, %cst_121 {dimension_numbers = #tpu.dot_dimension_numbers<[1], [0], [0], [1], [0, 0, 1, 1], [], []>} : vector<2x32xbf16>, vector<32x128xbf16>, vector<2x128xf32> -> vector<2x128xf32>
    %367 = arith.addf %364, %366 : vector<2x128xf32>
    %368 = vector.extract_strided_slice %367 {offsets = [0, 0], sizes = [2, 32], strides = [1, 1]} : vector<2x128xf32> to vector<2x32xf32>
    %369 = arith.negf %368 : vector<2x32xf32>
    %370 = math.exp %369 : vector<2x32xf32>
    %cst_122 = arith.constant 1.000000e+00 : f32
    %371 = vector.broadcast %cst_122 : f32 to vector<2x32xf32>
    %372 = arith.addf %371, %370 : vector<2x32xf32>
    %373 = arith.divf %371, %372 : vector<2x32xf32>
    %374 = vector.extract_strided_slice %367 {offsets = [0, 32], sizes = [2, 32], strides = [1, 1]} : vector<2x128xf32> to vector<2x32xf32>
    %375 = arith.negf %374 : vector<2x32xf32>
    %376 = math.exp %375 : vector<2x32xf32>
    %cst_123 = arith.constant 1.000000e+00 : f32
    %377 = vector.broadcast %cst_123 : f32 to vector<2x32xf32>
    %378 = arith.addf %377, %376 : vector<2x32xf32>
    %379 = arith.divf %377, %378 : vector<2x32xf32>
    %380 = vector.extract_strided_slice %367 {offsets = [0, 64], sizes = [2, 32], strides = [1, 1]} : vector<2x128xf32> to vector<2x32xf32>
    %381 = math.tanh %380 : vector<2x32xf32>
    %382 = vector.extract_strided_slice %367 {offsets = [0, 96], sizes = [2, 32], strides = [1, 1]} : vector<2x128xf32> to vector<2x32xf32>
    %383 = arith.negf %382 : vector<2x32xf32>
    %384 = math.exp %383 : vector<2x32xf32>
    %cst_124 = arith.constant 1.000000e+00 : f32
    %385 = vector.broadcast %cst_124 : f32 to vector<2x32xf32>
    %386 = arith.addf %385, %384 : vector<2x32xf32>
    %387 = arith.divf %385, %386 : vector<2x32xf32>
    %388 = arith.mulf %379, %305 : vector<2x32xf32>
    %389 = arith.mulf %373, %381 : vector<2x32xf32>
    %390 = arith.addf %388, %389 : vector<2x32xf32>
    %391 = math.tanh %390 : vector<2x32xf32>
    %392 = arith.mulf %387, %391 : vector<2x32xf32>
    %393 = arith.index_cast %361 : i32 to index
    %c0_125 = arith.constant 0 : index
    %c0_126 = arith.constant 0 : index
    %394 = vector.load %arg10[%393, %c0_125, %c0_126] : memref<8x2x128xf32, #tpu.memory_space<vmem>>, vector<1x2x128xf32>
    %395 = vector.shape_cast %394 : vector<1x2x128xf32> to vector<2x128xf32>
    %396 = arith.truncf %338 : vector<2x32xf32> to vector<2x32xbf16>
    %cst_127 = arith.constant dense<0.000000e+00> : vector<2x128xf32>
    %397 = tpu.matmul %396, %16, %cst_127 {dimension_numbers = #tpu.dot_dimension_numbers<[1], [0], [0], [1], [0, 0, 1, 1], [], []>} : vector<2x32xbf16>, vector<32x128xbf16>, vector<2x128xf32> -> vector<2x128xf32>
    %398 = arith.addf %395, %397 : vector<2x128xf32>
    %399 = vector.extract_strided_slice %398 {offsets = [0, 0], sizes = [2, 32], strides = [1, 1]} : vector<2x128xf32> to vector<2x32xf32>
    %400 = arith.negf %399 : vector<2x32xf32>
    %401 = math.exp %400 : vector<2x32xf32>
    %cst_128 = arith.constant 1.000000e+00 : f32
    %402 = vector.broadcast %cst_128 : f32 to vector<2x32xf32>
    %403 = arith.addf %402, %401 : vector<2x32xf32>
    %404 = arith.divf %402, %403 : vector<2x32xf32>
    %405 = vector.extract_strided_slice %398 {offsets = [0, 32], sizes = [2, 32], strides = [1, 1]} : vector<2x128xf32> to vector<2x32xf32>
    %406 = arith.negf %405 : vector<2x32xf32>
    %407 = math.exp %406 : vector<2x32xf32>
    %cst_129 = arith.constant 1.000000e+00 : f32
    %408 = vector.broadcast %cst_129 : f32 to vector<2x32xf32>
    %409 = arith.addf %408, %407 : vector<2x32xf32>
    %410 = arith.divf %408, %409 : vector<2x32xf32>
    %411 = vector.extract_strided_slice %398 {offsets = [0, 64], sizes = [2, 32], strides = [1, 1]} : vector<2x128xf32> to vector<2x32xf32>
    %412 = math.tanh %411 : vector<2x32xf32>
    %413 = vector.extract_strided_slice %398 {offsets = [0, 96], sizes = [2, 32], strides = [1, 1]} : vector<2x128xf32> to vector<2x32xf32>
    %414 = arith.negf %413 : vector<2x32xf32>
    %415 = math.exp %414 : vector<2x32xf32>
    %cst_130 = arith.constant 1.000000e+00 : f32
    %416 = vector.broadcast %cst_130 : f32 to vector<2x32xf32>
    %417 = arith.addf %416, %415 : vector<2x32xf32>
    %418 = arith.divf %416, %417 : vector<2x32xf32>
    %419 = arith.mulf %410, %336 : vector<2x32xf32>
    %420 = arith.mulf %404, %412 : vector<2x32xf32>
    %421 = arith.addf %419, %420 : vector<2x32xf32>
    %422 = math.tanh %421 : vector<2x32xf32>
    %423 = arith.mulf %418, %422 : vector<2x32xf32>
    %424 = arith.index_cast %c4_i32 : i32 to index
    %c0_131 = arith.constant 0 : index
    %c0_132 = arith.constant 0 : index
    %425 = vector.load %arg8[%424, %c0_131, %c0_132] : memref<8x2x12xf32, #tpu.memory_space<vmem>>, vector<1x2x12xf32>
    %426 = vector.shape_cast %425 : vector<1x2x12xf32> to vector<2x12xf32>
    %427 = arith.truncf %392 : vector<2x32xf32> to vector<2x32xbf16>
    %cst_133 = arith.constant dense<0.000000e+00> : vector<2x12xf32>
    %428 = tpu.matmul %427, %17, %cst_133 {dimension_numbers = #tpu.dot_dimension_numbers<[1], [0], [0], [1], [0, 0, 1, 1], [], []>} : vector<2x32xbf16>, vector<32x12xbf16>, vector<2x12xf32> -> vector<2x12xf32>
    %429 = vector.broadcast %19 : vector<1x12xf32> to vector<2x12xf32>
    %430 = arith.addf %428, %429 : vector<2x12xf32>
    %431 = arith.addf %426, %430 : vector<2x12xf32>
    %432 = arith.index_cast %c4_i32 : i32 to index
    %c0_134 = arith.constant 0 : index
    %c0_135 = arith.constant 0 : index
    %433 = vector.load %arg8[%432, %c0_134, %c0_135] : memref<8x2x12xf32, #tpu.memory_space<vmem>>, vector<1x2x12xf32>
    %434 = vector.shape_cast %433 : vector<1x2x12xf32> to vector<2x12xf32>
    %435 = vector.shape_cast %431 : vector<2x12xf32> to vector<1x2x12xf32>
    tpu.vector_store %arg8[%432, %c0_134, %c0_135], %435 {strides = array<i32>} : memref<8x2x12xf32, #tpu.memory_space<vmem>>, vector<1x2x12xf32>,
    %436 = arith.index_cast %361 : i32 to index
    %c0_136 = arith.constant 0 : index
    %c0_137 = arith.constant 0 : index
    %437 = vector.load %arg8[%436, %c0_136, %c0_137] : memref<8x2x12xf32, #tpu.memory_space<vmem>>, vector<1x2x12xf32>
    %438 = vector.shape_cast %437 : vector<1x2x12xf32> to vector<2x12xf32>
    %439 = arith.truncf %423 : vector<2x32xf32> to vector<2x32xbf16>
    %cst_138 = arith.constant dense<0.000000e+00> : vector<2x12xf32>
    %440 = tpu.matmul %439, %18, %cst_138 {dimension_numbers = #tpu.dot_dimension_numbers<[1], [0], [0], [1], [0, 0, 1, 1], [], []>} : vector<2x32xbf16>, vector<32x12xbf16>, vector<2x12xf32> -> vector<2x12xf32>
    %441 = arith.addf %438, %440 : vector<2x12xf32>
    %442 = arith.index_cast %361 : i32 to index
    %c0_139 = arith.constant 0 : index
    %c0_140 = arith.constant 0 : index
    %443 = vector.load %arg8[%442, %c0_139, %c0_140] : memref<8x2x12xf32, #tpu.memory_space<vmem>>, vector<1x2x12xf32>
    %444 = vector.shape_cast %443 : vector<1x2x12xf32> to vector<2x12xf32>
    %445 = vector.shape_cast %441 : vector<2x12xf32> to vector<1x2x12xf32>
    tpu.vector_store %arg8[%442, %c0_139, %c0_140], %445 {strides = array<i32>} : memref<8x2x12xf32, #tpu.memory_space<vmem>>, vector<1x2x12xf32>,
    %c5_i32 = arith.constant 5 : i32
    %c7_i32_141 = arith.constant 7 : i32
    %446 = arith.subi %c7_i32_141, %c5_i32 : i32
    %447 = arith.index_cast %c5_i32 : i32 to index
    %c0_142 = arith.constant 0 : index
    %c0_143 = arith.constant 0 : index
    %448 = vector.load %arg9[%447, %c0_142, %c0_143] : memref<8x2x128xf32, #tpu.memory_space<vmem>>, vector<1x2x128xf32>
    %449 = vector.shape_cast %448 : vector<1x2x128xf32> to vector<2x128xf32>
    %450 = arith.truncf %392 : vector<2x32xf32> to vector<2x32xbf16>
    %cst_144 = arith.constant dense<0.000000e+00> : vector<2x128xf32>
    %451 = tpu.matmul %450, %15, %cst_144 {dimension_numbers = #tpu.dot_dimension_numbers<[1], [0], [0], [1], [0, 0, 1, 1], [], []>} : vector<2x32xbf16>, vector<32x128xbf16>, vector<2x128xf32> -> vector<2x128xf32>
    %452 = arith.addf %449, %451 : vector<2x128xf32>
    %453 = vector.extract_strided_slice %452 {offsets = [0, 0], sizes = [2, 32], strides = [1, 1]} : vector<2x128xf32> to vector<2x32xf32>
    %454 = arith.negf %453 : vector<2x32xf32>
    %455 = math.exp %454 : vector<2x32xf32>
    %cst_145 = arith.constant 1.000000e+00 : f32
    %456 = vector.broadcast %cst_145 : f32 to vector<2x32xf32>
    %457 = arith.addf %456, %455 : vector<2x32xf32>
    %458 = arith.divf %456, %457 : vector<2x32xf32>
    %459 = vector.extract_strided_slice %452 {offsets = [0, 32], sizes = [2, 32], strides = [1, 1]} : vector<2x128xf32> to vector<2x32xf32>
    %460 = arith.negf %459 : vector<2x32xf32>
    %461 = math.exp %460 : vector<2x32xf32>
    %cst_146 = arith.constant 1.000000e+00 : f32
    %462 = vector.broadcast %cst_146 : f32 to vector<2x32xf32>
    %463 = arith.addf %462, %461 : vector<2x32xf32>
    %464 = arith.divf %462, %463 : vector<2x32xf32>
    %465 = vector.extract_strided_slice %452 {offsets = [0, 64], sizes = [2, 32], strides = [1, 1]} : vector<2x128xf32> to vector<2x32xf32>
    %466 = math.tanh %465 : vector<2x32xf32>
    %467 = vector.extract_strided_slice %452 {offsets = [0, 96], sizes = [2, 32], strides = [1, 1]} : vector<2x128xf32> to vector<2x32xf32>
    %468 = arith.negf %467 : vector<2x32xf32>
    %469 = math.exp %468 : vector<2x32xf32>
    %cst_147 = arith.constant 1.000000e+00 : f32
    %470 = vector.broadcast %cst_147 : f32 to vector<2x32xf32>
    %471 = arith.addf %470, %469 : vector<2x32xf32>
    %472 = arith.divf %470, %471 : vector<2x32xf32>
    %473 = arith.mulf %464, %390 : vector<2x32xf32>
    %474 = arith.mulf %458, %466 : vector<2x32xf32>
    %475 = arith.addf %473, %474 : vector<2x32xf32>
    %476 = math.tanh %475 : vector<2x32xf32>
    %477 = arith.mulf %472, %476 : vector<2x32xf32>
    %478 = arith.index_cast %446 : i32 to index
    %c0_148 = arith.constant 0 : index
    %c0_149 = arith.constant 0 : index
    %479 = vector.load %arg10[%478, %c0_148, %c0_149] : memref<8x2x128xf32, #tpu.memory_space<vmem>>, vector<1x2x128xf32>
    %480 = vector.shape_cast %479 : vector<1x2x128xf32> to vector<2x128xf32>
    %481 = arith.truncf %423 : vector<2x32xf32> to vector<2x32xbf16>
    %cst_150 = arith.constant dense<0.000000e+00> : vector<2x128xf32>
    %482 = tpu.matmul %481, %16, %cst_150 {dimension_numbers = #tpu.dot_dimension_numbers<[1], [0], [0], [1], [0, 0, 1, 1], [], []>} : vector<2x32xbf16>, vector<32x128xbf16>, vector<2x128xf32> -> vector<2x128xf32>
    %483 = arith.addf %480, %482 : vector<2x128xf32>
    %484 = vector.extract_strided_slice %483 {offsets = [0, 0], sizes = [2, 32], strides = [1, 1]} : vector<2x128xf32> to vector<2x32xf32>
    %485 = arith.negf %484 : vector<2x32xf32>
    %486 = math.exp %485 : vector<2x32xf32>
    %cst_151 = arith.constant 1.000000e+00 : f32
    %487 = vector.broadcast %cst_151 : f32 to vector<2x32xf32>
    %488 = arith.addf %487, %486 : vector<2x32xf32>
    %489 = arith.divf %487, %488 : vector<2x32xf32>
    %490 = vector.extract_strided_slice %483 {offsets = [0, 32], sizes = [2, 32], strides = [1, 1]} : vector<2x128xf32> to vector<2x32xf32>
    %491 = arith.negf %490 : vector<2x32xf32>
    %492 = math.exp %491 : vector<2x32xf32>
    %cst_152 = arith.constant 1.000000e+00 : f32
    %493 = vector.broadcast %cst_152 : f32 to vector<2x32xf32>
    %494 = arith.addf %493, %492 : vector<2x32xf32>
    %495 = arith.divf %493, %494 : vector<2x32xf32>
    %496 = vector.extract_strided_slice %483 {offsets = [0, 64], sizes = [2, 32], strides = [1, 1]} : vector<2x128xf32> to vector<2x32xf32>
    %497 = math.tanh %496 : vector<2x32xf32>
    %498 = vector.extract_strided_slice %483 {offsets = [0, 96], sizes = [2, 32], strides = [1, 1]} : vector<2x128xf32> to vector<2x32xf32>
    %499 = arith.negf %498 : vector<2x32xf32>
    %500 = math.exp %499 : vector<2x32xf32>
    %cst_153 = arith.constant 1.000000e+00 : f32
    %501 = vector.broadcast %cst_153 : f32 to vector<2x32xf32>
    %502 = arith.addf %501, %500 : vector<2x32xf32>
    %503 = arith.divf %501, %502 : vector<2x32xf32>
    %504 = arith.mulf %495, %421 : vector<2x32xf32>
    %505 = arith.mulf %489, %497 : vector<2x32xf32>
    %506 = arith.addf %504, %505 : vector<2x32xf32>
    %507 = math.tanh %506 : vector<2x32xf32>
    %508 = arith.mulf %503, %507 : vector<2x32xf32>
    %509 = arith.index_cast %c5_i32 : i32 to index
    %c0_154 = arith.constant 0 : index
    %c0_155 = arith.constant 0 : index
    %510 = vector.load %arg8[%509, %c0_154, %c0_155] : memref<8x2x12xf32, #tpu.memory_space<vmem>>, vector<1x2x12xf32>
    %511 = vector.shape_cast %510 : vector<1x2x12xf32> to vector<2x12xf32>
    %512 = arith.truncf %477 : vector<2x32xf32> to vector<2x32xbf16>
    %cst_156 = arith.constant dense<0.000000e+00> : vector<2x12xf32>
    %513 = tpu.matmul %512, %17, %cst_156 {dimension_numbers = #tpu.dot_dimension_numbers<[1], [0], [0], [1], [0, 0, 1, 1], [], []>} : vector<2x32xbf16>, vector<32x12xbf16>, vector<2x12xf32> -> vector<2x12xf32>
    %514 = vector.broadcast %19 : vector<1x12xf32> to vector<2x12xf32>
    %515 = arith.addf %513, %514 : vector<2x12xf32>
    %516 = arith.addf %511, %515 : vector<2x12xf32>
    %517 = arith.index_cast %c5_i32 : i32 to index
    %c0_157 = arith.constant 0 : index
    %c0_158 = arith.constant 0 : index
    %518 = vector.load %arg8[%517, %c0_157, %c0_158] : memref<8x2x12xf32, #tpu.memory_space<vmem>>, vector<1x2x12xf32>
    %519 = vector.shape_cast %518 : vector<1x2x12xf32> to vector<2x12xf32>
    %520 = vector.shape_cast %516 : vector<2x12xf32> to vector<1x2x12xf32>
    tpu.vector_store %arg8[%517, %c0_157, %c0_158], %520 {strides = array<i32>} : memref<8x2x12xf32, #tpu.memory_space<vmem>>, vector<1x2x12xf32>,
    %521 = arith.index_cast %446 : i32 to index
    %c0_159 = arith.constant 0 : index
    %c0_160 = arith.constant 0 : index
    %522 = vector.load %arg8[%521, %c0_159, %c0_160] : memref<8x2x12xf32, #tpu.memory_space<vmem>>, vector<1x2x12xf32>
    %523 = vector.shape_cast %522 : vector<1x2x12xf32> to vector<2x12xf32>
    %524 = arith.truncf %508 : vector<2x32xf32> to vector<2x32xbf16>
    %cst_161 = arith.constant dense<0.000000e+00> : vector<2x12xf32>
    %525 = tpu.matmul %524, %18, %cst_161 {dimension_numbers = #tpu.dot_dimension_numbers<[1], [0], [0], [1], [0, 0, 1, 1], [], []>} : vector<2x32xbf16>, vector<32x12xbf16>, vector<2x12xf32> -> vector<2x12xf32>
    %526 = arith.addf %523, %525 : vector<2x12xf32>
    %527 = arith.index_cast %446 : i32 to index
    %c0_162 = arith.constant 0 : index
    %c0_163 = arith.constant 0 : index
    %528 = vector.load %arg8[%527, %c0_162, %c0_163] : memref<8x2x12xf32, #tpu.memory_space<vmem>>, vector<1x2x12xf32>
    %529 = vector.shape_cast %528 : vector<1x2x12xf32> to vector<2x12xf32>
    %530 = vector.shape_cast %526 : vector<2x12xf32> to vector<1x2x12xf32>
    tpu.vector_store %arg8[%527, %c0_162, %c0_163], %530 {strides = array<i32>} : memref<8x2x12xf32, #tpu.memory_space<vmem>>, vector<1x2x12xf32>,
    %c6_i32 = arith.constant 6 : i32
    %c7_i32_164 = arith.constant 7 : i32
    %531 = arith.subi %c7_i32_164, %c6_i32 : i32
    %532 = arith.index_cast %c6_i32 : i32 to index
    %c0_165 = arith.constant 0 : index
    %c0_166 = arith.constant 0 : index
    %533 = vector.load %arg9[%532, %c0_165, %c0_166] : memref<8x2x128xf32, #tpu.memory_space<vmem>>, vector<1x2x128xf32>
    %534 = vector.shape_cast %533 : vector<1x2x128xf32> to vector<2x128xf32>
    %535 = arith.truncf %477 : vector<2x32xf32> to vector<2x32xbf16>
    %cst_167 = arith.constant dense<0.000000e+00> : vector<2x128xf32>
    %536 = tpu.matmul %535, %15, %cst_167 {dimension_numbers = #tpu.dot_dimension_numbers<[1], [0], [0], [1], [0, 0, 1, 1], [], []>} : vector<2x32xbf16>, vector<32x128xbf16>, vector<2x128xf32> -> vector<2x128xf32>
    %537 = arith.addf %534, %536 : vector<2x128xf32>
    %538 = vector.extract_strided_slice %537 {offsets = [0, 0], sizes = [2, 32], strides = [1, 1]} : vector<2x128xf32> to vector<2x32xf32>
    %539 = arith.negf %538 : vector<2x32xf32>
    %540 = math.exp %539 : vector<2x32xf32>
    %cst_168 = arith.constant 1.000000e+00 : f32
    %541 = vector.broadcast %cst_168 : f32 to vector<2x32xf32>
    %542 = arith.addf %541, %540 : vector<2x32xf32>
    %543 = arith.divf %541, %542 : vector<2x32xf32>
    %544 = vector.extract_strided_slice %537 {offsets = [0, 32], sizes = [2, 32], strides = [1, 1]} : vector<2x128xf32> to vector<2x32xf32>
    %545 = arith.negf %544 : vector<2x32xf32>
    %546 = math.exp %545 : vector<2x32xf32>
    %cst_169 = arith.constant 1.000000e+00 : f32
    %547 = vector.broadcast %cst_169 : f32 to vector<2x32xf32>
    %548 = arith.addf %547, %546 : vector<2x32xf32>
    %549 = arith.divf %547, %548 : vector<2x32xf32>
    %550 = vector.extract_strided_slice %537 {offsets = [0, 64], sizes = [2, 32], strides = [1, 1]} : vector<2x128xf32> to vector<2x32xf32>
    %551 = math.tanh %550 : vector<2x32xf32>
    %552 = vector.extract_strided_slice %537 {offsets = [0, 96], sizes = [2, 32], strides = [1, 1]} : vector<2x128xf32> to vector<2x32xf32>
    %553 = arith.negf %552 : vector<2x32xf32>
    %554 = math.exp %553 : vector<2x32xf32>
    %cst_170 = arith.constant 1.000000e+00 : f32
    %555 = vector.broadcast %cst_170 : f32 to vector<2x32xf32>
    %556 = arith.addf %555, %554 : vector<2x32xf32>
    %557 = arith.divf %555, %556 : vector<2x32xf32>
    %558 = arith.mulf %549, %475 : vector<2x32xf32>
    %559 = arith.mulf %543, %551 : vector<2x32xf32>
    %560 = arith.addf %558, %559 : vector<2x32xf32>
    %561 = math.tanh %560 : vector<2x32xf32>
    %562 = arith.mulf %557, %561 : vector<2x32xf32>
    %563 = arith.index_cast %531 : i32 to index
    %c0_171 = arith.constant 0 : index
    %c0_172 = arith.constant 0 : index
    %564 = vector.load %arg10[%563, %c0_171, %c0_172] : memref<8x2x128xf32, #tpu.memory_space<vmem>>, vector<1x2x128xf32>
    %565 = vector.shape_cast %564 : vector<1x2x128xf32> to vector<2x128xf32>
    %566 = arith.truncf %508 : vector<2x32xf32> to vector<2x32xbf16>
    %cst_173 = arith.constant dense<0.000000e+00> : vector<2x128xf32>
    %567 = tpu.matmul %566, %16, %cst_173 {dimension_numbers = #tpu.dot_dimension_numbers<[1], [0], [0], [1], [0, 0, 1, 1], [], []>} : vector<2x32xbf16>, vector<32x128xbf16>, vector<2x128xf32> -> vector<2x128xf32>
    %568 = arith.addf %565, %567 : vector<2x128xf32>
    %569 = vector.extract_strided_slice %568 {offsets = [0, 0], sizes = [2, 32], strides = [1, 1]} : vector<2x128xf32> to vector<2x32xf32>
    %570 = arith.negf %569 : vector<2x32xf32>
    %571 = math.exp %570 : vector<2x32xf32>
    %cst_174 = arith.constant 1.000000e+00 : f32
    %572 = vector.broadcast %cst_174 : f32 to vector<2x32xf32>
    %573 = arith.addf %572, %571 : vector<2x32xf32>
    %574 = arith.divf %572, %573 : vector<2x32xf32>
    %575 = vector.extract_strided_slice %568 {offsets = [0, 32], sizes = [2, 32], strides = [1, 1]} : vector<2x128xf32> to vector<2x32xf32>
    %576 = arith.negf %575 : vector<2x32xf32>
    %577 = math.exp %576 : vector<2x32xf32>
    %cst_175 = arith.constant 1.000000e+00 : f32
    %578 = vector.broadcast %cst_175 : f32 to vector<2x32xf32>
    %579 = arith.addf %578, %577 : vector<2x32xf32>
    %580 = arith.divf %578, %579 : vector<2x32xf32>
    %581 = vector.extract_strided_slice %568 {offsets = [0, 64], sizes = [2, 32], strides = [1, 1]} : vector<2x128xf32> to vector<2x32xf32>
    %582 = math.tanh %581 : vector<2x32xf32>
    %583 = vector.extract_strided_slice %568 {offsets = [0, 96], sizes = [2, 32], strides = [1, 1]} : vector<2x128xf32> to vector<2x32xf32>
    %584 = arith.negf %583 : vector<2x32xf32>
    %585 = math.exp %584 : vector<2x32xf32>
    %cst_176 = arith.constant 1.000000e+00 : f32
    %586 = vector.broadcast %cst_176 : f32 to vector<2x32xf32>
    %587 = arith.addf %586, %585 : vector<2x32xf32>
    %588 = arith.divf %586, %587 : vector<2x32xf32>
    %589 = arith.mulf %580, %506 : vector<2x32xf32>
    %590 = arith.mulf %574, %582 : vector<2x32xf32>
    %591 = arith.addf %589, %590 : vector<2x32xf32>
    %592 = math.tanh %591 : vector<2x32xf32>
    %593 = arith.mulf %588, %592 : vector<2x32xf32>
    %594 = arith.index_cast %c6_i32 : i32 to index
    %c0_177 = arith.constant 0 : index
    %c0_178 = arith.constant 0 : index
    %595 = vector.load %arg8[%594, %c0_177, %c0_178] : memref<8x2x12xf32, #tpu.memory_space<vmem>>, vector<1x2x12xf32>
    %596 = vector.shape_cast %595 : vector<1x2x12xf32> to vector<2x12xf32>
    %597 = arith.truncf %562 : vector<2x32xf32> to vector<2x32xbf16>
    %cst_179 = arith.constant dense<0.000000e+00> : vector<2x12xf32>
    %598 = tpu.matmul %597, %17, %cst_179 {dimension_numbers = #tpu.dot_dimension_numbers<[1], [0], [0], [1], [0, 0, 1, 1], [], []>} : vector<2x32xbf16>, vector<32x12xbf16>, vector<2x12xf32> -> vector<2x12xf32>
    %599 = vector.broadcast %19 : vector<1x12xf32> to vector<2x12xf32>
    %600 = arith.addf %598, %599 : vector<2x12xf32>
    %601 = arith.addf %596, %600 : vector<2x12xf32>
    %602 = arith.index_cast %c6_i32 : i32 to index
    %c0_180 = arith.constant 0 : index
    %c0_181 = arith.constant 0 : index
    %603 = vector.load %arg8[%602, %c0_180, %c0_181] : memref<8x2x12xf32, #tpu.memory_space<vmem>>, vector<1x2x12xf32>
    %604 = vector.shape_cast %603 : vector<1x2x12xf32> to vector<2x12xf32>
    %605 = vector.shape_cast %601 : vector<2x12xf32> to vector<1x2x12xf32>
    tpu.vector_store %arg8[%602, %c0_180, %c0_181], %605 {strides = array<i32>} : memref<8x2x12xf32, #tpu.memory_space<vmem>>, vector<1x2x12xf32>,
    %606 = arith.index_cast %531 : i32 to index
    %c0_182 = arith.constant 0 : index
    %c0_183 = arith.constant 0 : index
    %607 = vector.load %arg8[%606, %c0_182, %c0_183] : memref<8x2x12xf32, #tpu.memory_space<vmem>>, vector<1x2x12xf32>
    %608 = vector.shape_cast %607 : vector<1x2x12xf32> to vector<2x12xf32>
    %609 = arith.truncf %593 : vector<2x32xf32> to vector<2x32xbf16>
    %cst_184 = arith.constant dense<0.000000e+00> : vector<2x12xf32>
    %610 = tpu.matmul %609, %18, %cst_184 {dimension_numbers = #tpu.dot_dimension_numbers<[1], [0], [0], [1], [0, 0, 1, 1], [], []>} : vector<2x32xbf16>, vector<32x12xbf16>, vector<2x12xf32> -> vector<2x12xf32>
    %611 = arith.addf %608, %610 : vector<2x12xf32>
    %612 = arith.index_cast %531 : i32 to index
    %c0_185 = arith.constant 0 : index
    %c0_186 = arith.constant 0 : index
    %613 = vector.load %arg8[%612, %c0_185, %c0_186] : memref<8x2x12xf32, #tpu.memory_space<vmem>>, vector<1x2x12xf32>
    %614 = vector.shape_cast %613 : vector<1x2x12xf32> to vector<2x12xf32>
    %615 = vector.shape_cast %611 : vector<2x12xf32> to vector<1x2x12xf32>
    tpu.vector_store %arg8[%612, %c0_185, %c0_186], %615 {strides = array<i32>} : memref<8x2x12xf32, #tpu.memory_space<vmem>>, vector<1x2x12xf32>,
    %c7_i32_187 = arith.constant 7 : i32
    %c7_i32_188 = arith.constant 7 : i32
    %616 = arith.subi %c7_i32_188, %c7_i32_187 : i32
    %617 = arith.index_cast %c7_i32_187 : i32 to index
    %c0_189 = arith.constant 0 : index
    %c0_190 = arith.constant 0 : index
    %618 = vector.load %arg9[%617, %c0_189, %c0_190] : memref<8x2x128xf32, #tpu.memory_space<vmem>>, vector<1x2x128xf32>
    %619 = vector.shape_cast %618 : vector<1x2x128xf32> to vector<2x128xf32>
    %620 = arith.truncf %562 : vector<2x32xf32> to vector<2x32xbf16>
    %cst_191 = arith.constant dense<0.000000e+00> : vector<2x128xf32>
    %621 = tpu.matmul %620, %15, %cst_191 {dimension_numbers = #tpu.dot_dimension_numbers<[1], [0], [0], [1], [0, 0, 1, 1], [], []>} : vector<2x32xbf16>, vector<32x128xbf16>, vector<2x128xf32> -> vector<2x128xf32>
    %622 = arith.addf %619, %621 : vector<2x128xf32>
    %623 = vector.extract_strided_slice %622 {offsets = [0, 0], sizes = [2, 32], strides = [1, 1]} : vector<2x128xf32> to vector<2x32xf32>
    %624 = arith.negf %623 : vector<2x32xf32>
    %625 = math.exp %624 : vector<2x32xf32>
    %cst_192 = arith.constant 1.000000e+00 : f32
    %626 = vector.broadcast %cst_192 : f32 to vector<2x32xf32>
    %627 = arith.addf %626, %625 : vector<2x32xf32>
    %628 = arith.divf %626, %627 : vector<2x32xf32>
    %629 = vector.extract_strided_slice %622 {offsets = [0, 32], sizes = [2, 32], strides = [1, 1]} : vector<2x128xf32> to vector<2x32xf32>
    %630 = arith.negf %629 : vector<2x32xf32>
    %631 = math.exp %630 : vector<2x32xf32>
    %cst_193 = arith.constant 1.000000e+00 : f32
    %632 = vector.broadcast %cst_193 : f32 to vector<2x32xf32>
    %633 = arith.addf %632, %631 : vector<2x32xf32>
    %634 = arith.divf %632, %633 : vector<2x32xf32>
    %635 = vector.extract_strided_slice %622 {offsets = [0, 64], sizes = [2, 32], strides = [1, 1]} : vector<2x128xf32> to vector<2x32xf32>
    %636 = math.tanh %635 : vector<2x32xf32>
    %637 = vector.extract_strided_slice %622 {offsets = [0, 96], sizes = [2, 32], strides = [1, 1]} : vector<2x128xf32> to vector<2x32xf32>
    %638 = arith.negf %637 : vector<2x32xf32>
    %639 = math.exp %638 : vector<2x32xf32>
    %cst_194 = arith.constant 1.000000e+00 : f32
    %640 = vector.broadcast %cst_194 : f32 to vector<2x32xf32>
    %641 = arith.addf %640, %639 : vector<2x32xf32>
    %642 = arith.divf %640, %641 : vector<2x32xf32>
    %643 = arith.mulf %634, %560 : vector<2x32xf32>
    %644 = arith.mulf %628, %636 : vector<2x32xf32>
    %645 = arith.addf %643, %644 : vector<2x32xf32>
    %646 = math.tanh %645 : vector<2x32xf32>
    %647 = arith.mulf %642, %646 : vector<2x32xf32>
    %648 = arith.index_cast %616 : i32 to index
    %c0_195 = arith.constant 0 : index
    %c0_196 = arith.constant 0 : index
    %649 = vector.load %arg10[%648, %c0_195, %c0_196] : memref<8x2x128xf32, #tpu.memory_space<vmem>>, vector<1x2x128xf32>
    %650 = vector.shape_cast %649 : vector<1x2x128xf32> to vector<2x128xf32>
    %651 = arith.truncf %593 : vector<2x32xf32> to vector<2x32xbf16>
    %cst_197 = arith.constant dense<0.000000e+00> : vector<2x128xf32>
    %652 = tpu.matmul %651, %16, %cst_197 {dimension_numbers = #tpu.dot_dimension_numbers<[1], [0], [0], [1], [0, 0, 1, 1], [], []>} : vector<2x32xbf16>, vector<32x128xbf16>, vector<2x128xf32> -> vector<2x128xf32>
    %653 = arith.addf %650, %652 : vector<2x128xf32>
    %654 = vector.extract_strided_slice %653 {offsets = [0, 0], sizes = [2, 32], strides = [1, 1]} : vector<2x128xf32> to vector<2x32xf32>
    %655 = arith.negf %654 : vector<2x32xf32>
    %656 = math.exp %655 : vector<2x32xf32>
    %cst_198 = arith.constant 1.000000e+00 : f32
    %657 = vector.broadcast %cst_198 : f32 to vector<2x32xf32>
    %658 = arith.addf %657, %656 : vector<2x32xf32>
    %659 = arith.divf %657, %658 : vector<2x32xf32>
    %660 = vector.extract_strided_slice %653 {offsets = [0, 32], sizes = [2, 32], strides = [1, 1]} : vector<2x128xf32> to vector<2x32xf32>
    %661 = arith.negf %660 : vector<2x32xf32>
    %662 = math.exp %661 : vector<2x32xf32>
    %cst_199 = arith.constant 1.000000e+00 : f32
    %663 = vector.broadcast %cst_199 : f32 to vector<2x32xf32>
    %664 = arith.addf %663, %662 : vector<2x32xf32>
    %665 = arith.divf %663, %664 : vector<2x32xf32>
    %666 = vector.extract_strided_slice %653 {offsets = [0, 64], sizes = [2, 32], strides = [1, 1]} : vector<2x128xf32> to vector<2x32xf32>
    %667 = math.tanh %666 : vector<2x32xf32>
    %668 = vector.extract_strided_slice %653 {offsets = [0, 96], sizes = [2, 32], strides = [1, 1]} : vector<2x128xf32> to vector<2x32xf32>
    %669 = arith.negf %668 : vector<2x32xf32>
    %670 = math.exp %669 : vector<2x32xf32>
    %cst_200 = arith.constant 1.000000e+00 : f32
    %671 = vector.broadcast %cst_200 : f32 to vector<2x32xf32>
    %672 = arith.addf %671, %670 : vector<2x32xf32>
    %673 = arith.divf %671, %672 : vector<2x32xf32>
    %674 = arith.mulf %665, %591 : vector<2x32xf32>
    %675 = arith.mulf %659, %667 : vector<2x32xf32>
    %676 = arith.addf %674, %675 : vector<2x32xf32>
    %677 = math.tanh %676 : vector<2x32xf32>
    %678 = arith.mulf %673, %677 : vector<2x32xf32>
    %679 = arith.index_cast %c7_i32_187 : i32 to index
    %c0_201 = arith.constant 0 : index
    %c0_202 = arith.constant 0 : index
    %680 = vector.load %arg8[%679, %c0_201, %c0_202] : memref<8x2x12xf32, #tpu.memory_space<vmem>>, vector<1x2x12xf32>
    %681 = vector.shape_cast %680 : vector<1x2x12xf32> to vector<2x12xf32>
    %682 = arith.truncf %647 : vector<2x32xf32> to vector<2x32xbf16>
    %cst_203 = arith.constant dense<0.000000e+00> : vector<2x12xf32>
    %683 = tpu.matmul %682, %17, %cst_203 {dimension_numbers = #tpu.dot_dimension_numbers<[1], [0], [0], [1], [0, 0, 1, 1], [], []>} : vector<2x32xbf16>, vector<32x12xbf16>, vector<2x12xf32> -> vector<2x12xf32>
    %684 = vector.broadcast %19 : vector<1x12xf32> to vector<2x12xf32>
    %685 = arith.addf %683, %684 : vector<2x12xf32>
    %686 = arith.addf %681, %685 : vector<2x12xf32>
    %687 = arith.index_cast %c7_i32_187 : i32 to index
    %c0_204 = arith.constant 0 : index
    %c0_205 = arith.constant 0 : index
    %688 = vector.load %arg8[%687, %c0_204, %c0_205] : memref<8x2x12xf32, #tpu.memory_space<vmem>>, vector<1x2x12xf32>
    %689 = vector.shape_cast %688 : vector<1x2x12xf32> to vector<2x12xf32>
    %690 = vector.shape_cast %686 : vector<2x12xf32> to vector<1x2x12xf32>
    tpu.vector_store %arg8[%687, %c0_204, %c0_205], %690 {strides = array<i32>} : memref<8x2x12xf32, #tpu.memory_space<vmem>>, vector<1x2x12xf32>,
    %691 = arith.index_cast %616 : i32 to index
    %c0_206 = arith.constant 0 : index
    %c0_207 = arith.constant 0 : index
    %692 = vector.load %arg8[%691, %c0_206, %c0_207] : memref<8x2x12xf32, #tpu.memory_space<vmem>>, vector<1x2x12xf32>
    %693 = vector.shape_cast %692 : vector<1x2x12xf32> to vector<2x12xf32>
    %694 = arith.truncf %678 : vector<2x32xf32> to vector<2x32xbf16>
    %cst_208 = arith.constant dense<0.000000e+00> : vector<2x12xf32>
    %695 = tpu.matmul %694, %18, %cst_208 {dimension_numbers = #tpu.dot_dimension_numbers<[1], [0], [0], [1], [0, 0, 1, 1], [], []>} : vector<2x32xbf16>, vector<32x12xbf16>, vector<2x12xf32> -> vector<2x12xf32>
    %696 = arith.addf %693, %695 : vector<2x12xf32>
    %697 = arith.index_cast %616 : i32 to index
    %c0_209 = arith.constant 0 : index
    %c0_210 = arith.constant 0 : index
    %698 = vector.load %arg8[%697, %c0_209, %c0_210] : memref<8x2x12xf32, #tpu.memory_space<vmem>>, vector<1x2x12xf32>
    %699 = vector.shape_cast %698 : vector<1x2x12xf32> to vector<2x12xf32>
    %700 = vector.shape_cast %696 : vector<2x12xf32> to vector<1x2x12xf32>
    tpu.vector_store %arg8[%697, %c0_209, %c0_210], %700 {strides = array<i32>} : memref<8x2x12xf32, #tpu.memory_space<vmem>>, vector<1x2x12xf32>,
    %c8_i32 = arith.constant 8 : i32
    return
  }
}

</mosaic_0001>

<bundles_post_ra>
// kernel: tpu_custom_call.1
= control target key start
LH: loop header
LB: loop body
LE: loop exit
PB: predicated region body
PF: predicated region fallthrough
CT: control target
= control target key end

     0   :  { %13 = vsyncpa [#allocation5], 0  ;;  %s3453_s0 = inlined_call_operand.hbm [shape: bf16[8,2,16], index: 0, kind: input, shape index: {}]   ;;  %s3454_s1 = inlined_call_operand.vmem [shape: bf16[16,256], index: 1, kind: input, shape index: {}]   ;;  %s3455_s2 = inlined_call_operand.vmem [shape: f32[1,256], index: 2, kind: input, shape index: {}]   ;;  %s3456_s3 = inlined_call_operand.vmem [shape: bf16[32,128], index: 3, kind: input, shape index: {}]   ;;  %s3457_s4 = inlined_call_operand.vmem [shape: bf16[32,128], index: 4, kind: input, shape index: {}]   ;;  %s3458_s5 = inlined_call_operand.vmem [shape: bf16[32,12], index: 5, kind: input, shape index: {}]   ;;  %s3459_s6 = inlined_call_operand.vmem [shape: bf16[32,12], index: 6, kind: input, shape index: {}]   ;;  %s3460_s7 = inlined_call_operand.vmem [shape: f32[1,12], index: 7, kind: input, shape index: {}]   ;;  %s3461_s8 = inlined_call_operand.hbm [shape: f32[8,2,12], index: 8, kind: output, shape index: {}]  }
   0x1   :  { %14 = vsyncpa [#allocation6], 0  ;;  %s2889_s27 = smov [#allocation4]   ;;  %s2841_s9 = scalar_lea.hbm %s3453_s0, 128 }
   0x2   :  { %s20_s28 = sshll.u32 %s2889_s27, 4  ;;  %p2842_p0 = scmp.ne.s32.totalorder %s3453_s0, %s2841_s9  ;;  %s21_s28 = int_to_ptr.vmem [resolvable:$true] %s20_s28 }
   0x3   :  { %p2845_p1 = scmp.lt.u32.totalorder %s2841_s9, %s3453_s0 }
   0x5   :  { %p2847_p2 = pnand %p2845_p1, %p2842_p0 }
   0x7   :  { %2850 = shalt.err (!%p2847_p2)
}
   0x8   :  { %s2851_s14 = scalar_lea.vmem %s21_s28, 128  ;;  %p2856_p4 = scmp.lt.s32.totalorder %s21_s28, %s21_s28 }
   0x9   :  { %p2852_p3 = scmp.ne.s32.totalorder %s21_s28, %s2851_s14  ;;  %p2857_p5 = scmp.lt.s32.totalorder %s2851_s14, %s2851_s14 }
   0xb   :  { %p2858_p6 = por %p2857_p5, %p2856_p4 }
   0xd   :  { %p2859_p7 = pnand %p2858_p6, %p2852_p3 }
   0xf   :  { %2862 = shalt.err (!%p2859_p7)
}
  0x10   :  { %s2890_s15 = smov 16   ;;  %s2891_s16 = smov 1  }
  0x11   :  { %26 = dma.hbm_to_vmem [thread:$0]  %s3453_s0, 128, %s21_s28, [#allocation5], %s2890_s15, %s2890_s15, %s2891_s16  }
  0x12   :  { %2885 = dma.done.wait [#allocation5], 128  }
  0x13   :  { %2886 = vsyncadd [#allocation5], 4294967168  ;;  %v57_v0 = vlaneseq  ;;  %v2892_v1 = vmov 0   ;;  %v2893_v2 = vmov 1966171168   ;;  %v2894_v4 = vmov 0.0  }
  0x14   :  { %170 = vmatprep.mubr.bf16.mxu0 %v2892_v1  ;;  %v80_v3 = vunpack.c.l.s4 %v2893_v2  ;;  %2425 = vmatprep.subr.bf16.mxu1 %v2894_v4  ;;  %vm2895_vm0 = vmmov 0   ;;  %v2693_v7 = vld [vmem:[%s3454_s1 + $0x4] ss:$8 sps:$4 sm:$0xff]   ;;  %v2695_v9 = vld [vmem:[%s3454_s1] ss:$8 sps:$4 sm:$0xff]   ;;  %vm134_vm1 = vcmask 130048  }
  0x15   :  { %2429 = vmatprep.mubr.msk.bf16.mxu1 %vm2895_vm0, %v2894_v4  ;;  %v58_v5 = vshrl.u32 %v57_v0, 7  ;;  %v45_v10 = vld [vmem:[#allocation4] sm:$0x1]  ;;  %v46_v11 = vld [vmem:[#allocation4 + $0x1] sm:$0x1]  ;;  %138 = vmatprep.subr.bf16.mxu0 %v2693_v7  ;;  %v2977_v27 = vld [vmem:[%s3456_s3 + $0x8] sm:$0xff]  }
  0x16   :  { %v81_v6 = vunpack.c.0.s8 %v80_v3  ;;  %v47_v12 = vld [vmem:[#allocation4 + $0x2] sm:$0x1]  ;;  %v48_v13 = vld [vmem:[#allocation4 + $0x3] sm:$0x1]  ;;  %v49_v14 = vld [vmem:[#allocation4 + $0x4] sm:$0x1]  ;;  %v75_v15 = vcombine.low %v45_v10, %v46_v11  ;;  %139 = vmatpush1.bf16.msra.mxu0 %v2695_v9 }
  0x17   :  { %v50_v16 = vld [vmem:[#allocation4 + $0x5] sm:$0x1]  ;;  %v51_v17 = vld [vmem:[#allocation4 + $0x6] sm:$0x1]  ;;  %v52_v18 = vld [vmem:[#allocation4 + $0x7] sm:$0x1]  ;;  %v76_v19 = vcombine.low %v47_v12, %v48_v13  ;;  %2433 = vmatprep.subr.bf16.mxu0 %v2894_v4 }
  0x18   :  { %v84_v8 = vsub.s32 %v81_v6, %v58_v5  ;;  %v77_v20 = vcombine.low %v49_v14, %v50_v16  ;;  %v78_v21 = vcombine.low %v51_v17, %v52_v18  ;;  %v2970_v23 = vld [vmem:[%s3456_s3] sm:$0xff]   ;;  %v2993_v34 = vld [vmem:[%s3457_s4 + $0x8] sm:$0xff]   ;;  %v2896_v35 = vmov 1983009808   ;;  %s2898_s9 = smov 32  }
  0x19   :  { %2426 = vmatpush3.bf16.msra.mxu1 %v2970_v23  ;;  %v2984_v32 = vld [vmem:[%s3457_s4] sm:$0xff]   ;;  %v185_v36 = vunpack.c.l.s4 %v2896_v35  ;;  %v59_v37 = vsub.s32 0, %v58_v5  ;;  %v63_v39 = vsub.s32 1, %v58_v5  ;;  %vm285_vm2 = vcmask 91136  }
  0x1a   :  { %v85_v22 = vrot.slane %v75_v15, %v84_v8  ;;  %v92_v24 = vrot.slane %v76_v19, %v84_v8  ;;  %v99_v25 = vrot.slane %v77_v20, %v84_v8  ;;  %v106_v26 = vrot.slane %v78_v21, %v84_v8  ;;  %2427 = vmatprep.subr.bf16.mxu1 %v2894_v4  ;;  %v55_v38 = vld [vmem:[%s3455_s2] sm:$0x3]  ;;  %s2897_s2 = smov 64  }
  0x1b   :  { %v186_v40 = vunpack.c.0.s8 %v185_v36  ;;  %v60_v41 = vrot.slane %v55_v38, %v59_v37  ;;  %v64_v42 = vrot.slane %v55_v38, %v63_v39  ;;  %286 = vst.msk [vmem:[#allocation7] sm:$0x3] %vm285_vm2, %v2894_v4  ;;  %287 = vst.msk [vmem:[#allocation7 + $0x2] sm:$0x3] %vm285_vm2, %v2894_v4  ;;  %vm324_vm3 = vcmask 261120  }
  0x1c   :  { %v107_v28 = vcombine.low %v85_v22, %v92_v24  ;;  %v108_v29 = vcombine.low %v99_v25, %v106_v26  ;;  %288 = vst.msk [vmem:[#allocation7 + $0x4] sm:$0x3] %vm285_vm2, %v2894_v4  ;;  %289 = vst.msk [vmem:[#allocation7 + $0x6] sm:$0x3] %vm285_vm2, %v2894_v4 }
  0x1d   :  { %2428 = vmatpush3.bf16.msra.mxu1 %v2977_v27  ;;  %v189_v43 = vsub.s32 %v186_v40, %v58_v5  ;;  %290 = vst.msk [vmem:[#allocation7 + $0x8] sm:$0x3] %vm285_vm2, %v2894_v4  ;;  %291 = vst.msk [vmem:[#allocation7 + $0xa] sm:$0x3] %vm285_vm2, %v2894_v4 }
  0x1e   :  { %v115_v30 = vrot.slane %v107_v28, %v84_v8  ;;  %v122_v31 = vrot.slane %v108_v29, %v84_v8  ;;  %2441 = vmatprep.subr.bf16.mxu1 %v2894_v4  ;;  %292 = vst.msk [vmem:[#allocation7 + $0xc] sm:$0x3] %vm285_vm2, %v2894_v4  ;;  %293 = vst.msk [vmem:[#allocation7 + $0xe] sm:$0x3] %vm285_vm2, %v2894_v4 }
  0x20   :  { %v123_v33 = vcombine.low %v115_v30, %v122_v31  ;;  %2430 = vmatmul.mubr.bf16.vlgmr.msra.gmra.mrb[0].mxu1 %v2892_v1 }
  0x21   :  { %2445 = vmatprep.mubr.msk.bf16.mxu1 %vm2895_vm0, %v2894_v4 }
  0x22   :  { %2265 = vmatmul.mubr.msk.bf16.vlgmr.msra.gmra.mrb[0].mxu0 %vm134_vm1, %v123_v33 }
  0x23   :  { %2434 = vmatpush3.bf16.msra.mxu0 %v2984_v32  ;;  %2437 = vmatprep.mubr.msk.bf16.mxu0 %vm2895_vm0, %v2894_v4 }
  0x24   :  { %2435 = vmatprep.subr.bf16.mxu0 %v2894_v4 }
  0x27   :  { %2436 = vmatpush3.bf16.msra.mxu0 %v2993_v34 }
  0x28   :  { %2449 = vmatprep.subr.bf16.mxu0 %v2894_v4 }
  0x2a   :  { %2438 = vmatmul.mubr.bf16.vlgmr.msra.gmra.mrb[4].mxu0 %v2892_v1 }
  0x2b   :  { %2453 = vmatprep.mubr.msk.bf16.mxu0 %vm2895_vm0, %v2894_v4 }
  0xf3   :  { %v362_v44 = vpop.f32.mrb[0].mxu1 }
  0xf4   :  { %v2431_v46 = vpop.f32.mrb[1].mxu1 }
  0xf5   :  { %v172_v45 = vpop.f32.mrb[0].mxu0  ;;  %v365_v49 = vpop.f32.mrb[2].mxu1  ;;  %v3019_v46 = vld [vmem:[%s3458_s5] sm:$0xff]  }
  0xf6   :  { %v173_v47 = vadd.f32 %v172_v45, %v60_v41  ;;  %v174_v48 = vpop.f32.mrb[1].mxu0  ;;  %v2432_v52 = vpop.f32.mrb[3].mxu1  ;;  %2442 = vmatpush3.bf16.msra.mxu1 %v3019_v46  ;;  %v3034_v49 = vld [vmem:[%s3459_s6] sm:$0xff]  }
  0xf7   :  { %v175_v50 = vadd.f32 %v174_v48, %v64_v42  ;;  %v176_v51 = vpop.f32.mrb[2].mxu0  ;;  %2443 = vmatprep.subr.bf16.mxu1 %v2894_v4  ;;  %2450 = vmatpush3.bf16.msra.mxu0 %v3034_v49 }
  0xf8   :  { %v183_v53 = vcombine.high %v173_v47, %v173_v47  ;;  %v190_v54 = vrot.slane %v173_v47, %v189_v43  ;;  %2266 = vst.sshfl [vmem:[#allocation2] sm:$0x3 pattern:$0x76325410] %v173_v47  ;;  %v177_v55 = vadd.f32 %v176_v51, %v60_v41  ;;  %v178_v56 = vpop.f32.mrb[3].mxu0  ;;  %v3025_v47 = vld [vmem:[%s3458_s5 + $0x8] sm:$0xff]   ;;  %2451 = vmatprep.subr.bf16.mxu0 %v2894_v4 }
  0xf9   :  { %v235_v57 = vcombine.high %v175_v50, %v175_v50  ;;  %v242_v58 = vrot.slane %v175_v50, %v189_v43  ;;  %2270 = vst.sshfl [vmem:[#allocation3] sm:$0x3 pattern:$0x76325410] %v175_v50  ;;  %v179_v59 = vadd.f32 %v178_v56, %v64_v42  ;;  %v3040_v50 = vld [vmem:[%s3459_s6 + $0x8] sm:$0xff]  }
  0xfa   :  { %v197_v60 = vrot.slane %v183_v53, %v189_v43  ;;  %v198_v61 = vcombine.high %v190_v54, %v190_v54  ;;  %2267 = vst.sshfl [vmem:[#allocation2 + $0x4] sm:$0x3 pattern:$0x76325410] %v183_v53  ;;  %v200_v62 = vcombine.high %v177_v55, %v177_v55  ;;  %v207_v63 = vrot.slane %v177_v55, %v189_v43 }
  0xfb   :  { %2268 = vst.sshfl [vmem:[#allocation2 + $0x8] sm:$0x3 pattern:$0x76325410] %v177_v55  ;;  %v249_v0 = vrot.slane %v235_v57, %v189_v43  ;;  %v250_v1 = vcombine.high %v242_v58, %v242_v58  ;;  %v252_v2 = vcombine.high %v179_v59, %v179_v59  ;;  %v259_v3 = vrot.slane %v179_v59, %v189_v43 }
  0xfc   :  { %2271 = vst.sshfl [vmem:[#allocation3 + $0x4] sm:$0x3 pattern:$0x76325410] %v235_v57  ;;  %v199_v5 = vcombine.high %v197_v60, %v197_v60  ;;  %226 = vst [vmem:[#allocation2 + $0x2] sm:$0x3] %v198_v61  ;;  %v214_v6 = vrot.slane %v200_v62, %v189_v43  ;;  %v215_v7 = vcombine.high %v207_v63, %v207_v63  ;;  %2444 = vmatpush3.bf16.msra.mxu1 %v3025_v47 }
  0xfd   :  { %2272 = vst.sshfl [vmem:[#allocation3 + $0x8] sm:$0x3 pattern:$0x76325410] %v179_v59  ;;  %v251_v8 = vcombine.high %v249_v0, %v249_v0  ;;  %278 = vst [vmem:[#allocation3 + $0x2] sm:$0x3] %v250_v1  ;;  %v266_v9 = vrot.slane %v252_v2, %v189_v43  ;;  %v267_v10 = vcombine.high %v259_v3, %v259_v3  ;;  %2457 = vmatprep.subr.bf16.mxu1 %v2894_v4 }
  0xfe   :  { %2269 = vst.sshfl [vmem:[#allocation2 + $0xc] sm:$0x3 pattern:$0x76325410] %v200_v62  ;;  %v441_v11 = vpop.f32.mrb[4].mxu0  ;;  %v216_v12 = vcombine.high %v214_v6, %v214_v6  ;;  %2452 = vmatpush3.bf16.msra.mxu0 %v3040_v50 }
  0xff   :  { %2273 = vst.sshfl [vmem:[#allocation3 + $0xc] sm:$0x3 pattern:$0x76325410] %v252_v2  ;;  %228 = vst [vmem:[#allocation2 + $0x6] sm:$0x3] %v199_v5  ;;  %v268_v14 = vcombine.high %v266_v9, %v266_v9  ;;  %2465 = vmatprep.subr.bf16.mxu0 %v2894_v4 }
 0x100   :  { %230 = vst [vmem:[#allocation2 + $0xa] sm:$0x3] %v215_v7  ;;  %v2439_v13 = vpop.f32.mrb[5].mxu0  ;;  %280 = vst [vmem:[#allocation3 + $0x6] sm:$0x3] %v251_v8 }
 0x101   :  { %282 = vst [vmem:[#allocation3 + $0xa] sm:$0x3] %v267_v10  ;;  %v311_v15 = vld [vmem:[#allocation2] sm:$0x3]  ;;  %v444_v16 = vpop.f32.mrb[6].mxu0 }
 0x102   :  { %232 = vst [vmem:[#allocation2 + $0xe] sm:$0x3] %v216_v12  ;;  %v368_v17 = vadd.f32 %v362_v44, %v311_v15  ;;  %v2440_v18 = vpop.f32.mrb[7].mxu0  ;;  %284 = vst [vmem:[#allocation3 + $0xe] sm:$0x3] %v268_v14 }
 0x103   :  { %v3094_v59 = vld [vmem:[%s3460_s7] ss:$0 sm:$0xff]  ;;  %v472_v60 = vld [vmem:[#allocation7] sm:$0x3]  ;;  %v541_v3 = vld [vmem:[#allocation7 + $0xe] sm:$0x3] }
 0x104   :  { %2704 = vtanh.f32 %v368_v17  ;;  %v2276_v24 = vmul.f32 -1.442695, %v368_v17  ;;  %v604_v5 = vld [vmem:[#allocation2 + $0x2] sm:$0x3] }
 0x106   :  { %v671_v16 = vld [vmem:[#allocation3 + $0xc] sm:$0x3] }
 0x109   :  { %v394_v19 = vld [vmem:[#allocation3 + $0xe] sm:$0x3] }
 0x10a   :  { %v447_v20 = vadd.f32 %v441_v11, %v394_v19 }
 0x10c   :  { %2706 = vtanh.f32 %v447_v20  ;;  %v2279_v25 = vmul.f32 -1.442695, %v447_v20 }
 0x10d   :  { %2708 = vpow2.f32 %v2276_v24 }
 0x10e   :  { %v2705_v21 = vpop.eup %2704  ;;  %2710 = vpow2.f32 %v2279_v25 }
 0x10f   :  { %378 = vrot.lane.b32.xlu0 %v2705_v21, %s2897_s2 }
 0x116   :  { %v2707_v22 = vpop.eup %2706 }
 0x117   :  { %457 = vrot.lane.b32.xlu0 %v2707_v22, %s2897_s2  ;;  %v2709_v26 = vpop.eup %2708 }
 0x118   :  { %v372_v28 = vadd.f32 1.0, %v2709_v26  ;;  %v2711_v29 = vpop.eup %2710 }
 0x119   :  { %v451_v30 = vadd.f32 1.0, %v2711_v29 }
 0x11a   :  { %2712 = vrcp.f32 %v372_v28 }
 0x11b   :  { %2714 = vrcp.f32 %v451_v30 }
 0x124   :  { %v2713_v31 = vpop.eup %2712 }
 0x125   :  { %v2715_v36 = vpop.eup %2714  ;;  %v376_v39 = vmul.f32 0.0, %v2713_v31 }
 0x126   :  { %v455_v42 = vmul.f32 0.0, %v2715_v36 }
 0x181   :  { %v379_v33 = vpop.permute.xlu0 %378 }
 0x182   :  { %v381_v35 = vmul.f32 %v2713_v31, %v379_v33 }
 0x184   :  { %383 = vrot.lane.b32.xlu1 %v381_v35, %s2898_s9 }
 0x189   :  { %v458_v37 = vpop.permute.xlu0 %457 }
 0x18a   :  { %v460_v38 = vmul.f32 %v2715_v36, %v458_v37 }
 0x18c   :  { %462 = vrot.lane.b32.xlu1 %v460_v38, %s2898_s9 }
 0x1f6   :  { %v384_v40 = vpop.permute.xlu1 %383 }
 0x1f7   :  { %v3009_v41 = vadd.f32 %v384_v40, %v376_v39 }
 0x1f9   :  { %2716 = vtanh.f32 %v3009_v41 }
 0x1fe   :  { %v463_v43 = vpop.permute.xlu1 %462 }
 0x1ff   :  { %v3012_v44 = vadd.f32 %v463_v43, %v455_v42 }
 0x201   :  { %2718 = vtanh.f32 %v3012_v44 }
 0x203   :  { %v2717_v45 = vpop.eup %2716 }
 0x204   :  { %389 = vrot.lane.b32.xlu0 %v2717_v45, %s2897_s2 }
 0x20b   :  { %v2719_v48 = vpop.eup %2718 }
 0x20c   :  { %468 = vrot.lane.b32.xlu1 %v2719_v48, %s2897_s2 }
 0x276   :  { %v390_v51 = vpop.permute.xlu0 %389 }
 0x277   :  { %v392_v52 = vmul.f32 %v2713_v31, %v390_v51 }
 0x279   :  { %v473_v53 = vpack.c.bf16 %v392_v52, %v392_v52 }
 0x27b   :  { %481 = vrot.lane.b32.xlu0 %v473_v53, %s2898_s9 }
 0x27e   :  { %v469_v54 = vpop.permute.xlu1 %468 }
 0x27f   :  { %v471_v55 = vmul.f32 %v2715_v36, %v469_v54 }
 0x281   :  { %v542_v56 = vpack.c.bf16 %v471_v55, %v471_v55 }
 0x283   :  { %544 = vrot.lane.b32.xlu1 %v542_v56, %s2898_s9 }
 0x2ed   :  { %v482_v57 = vpop.permute.xlu0 %481 }
 0x2ee   :  { %2446 = vmatmul.mubr.msk.bf16.vlgmr.msra.gmra.mrb[4].mxu1 %vm324_vm3, %v482_v57 }
 0x2ef   :  { %2458 = vmatpush3.bf16.msra.mxu1 %v2970_v23  ;;  %2461 = vmatprep.mubr.msk.bf16.mxu1 %vm2895_vm0, %v2894_v4 }
 0x2f0   :  { %2459 = vmatprep.subr.bf16.mxu1 %v2894_v4 }
 0x2f3   :  { %2460 = vmatpush3.bf16.msra.mxu1 %v2977_v27 }
 0x2f4   :  { %2473 = vmatprep.subr.bf16.mxu1 %v2894_v4 }
 0x2f5   :  { %v545_v58 = vpop.permute.xlu1 %544 }
 0x2f6   :  { %2462 = vmatmul.mubr.msk.bf16.vlgmr.msra.gmra.mrb[8].mxu1 %vm324_vm3, %v482_v57  ;;  %2454 = vmatmul.mubr.msk.bf16.vlgmr.msra.gmra.mrb[8].mxu0 %vm324_vm3, %v545_v58 }
 0x2f7   :  { %2474 = vmatpush3.bf16.msra.mxu1 %v3019_v46  ;;  %2466 = vmatpush3.bf16.msra.mxu0 %v2984_v32 }
 0x2f8   :  { %2469 = vmatprep.mubr.msk.bf16.mxu0 %vm2895_vm0, %v2894_v4  ;;  %2467 = vmatprep.subr.bf16.mxu0 %v2894_v4 }
 0x2f9   :  { %2475 = vmatprep.subr.bf16.mxu1 %v2894_v4  ;;  %2477 = vmatprep.mubr.msk.bf16.mxu1 %vm2895_vm0, %v2894_v4 }
 0x2fb   :  { %2476 = vmatpush3.bf16.msra.mxu1 %v3025_v47  ;;  %2468 = vmatpush3.bf16.msra.mxu0 %v2993_v34 }
 0x2fc   :  { %2489 = vmatprep.subr.bf16.mxu1 %v2894_v4  ;;  %2481 = vmatprep.subr.bf16.mxu0 %v2894_v4 }
 0x2fe   :  { %2470 = vmatmul.mubr.msk.bf16.vlgmr.msra.gmra.mrb[12].mxu0 %vm324_vm3, %v545_v58 }
 0x2ff   :  { %2482 = vmatpush3.bf16.msra.mxu0 %v3034_v49  ;;  %2485 = vmatprep.mubr.msk.bf16.mxu0 %vm2895_vm0, %v2894_v4 }
 0x300   :  { %2483 = vmatprep.subr.bf16.mxu0 %v2894_v4 }
 0x303   :  { %2484 = vmatpush3.bf16.msra.mxu0 %v3040_v50 }
 0x304   :  { %2497 = vmatprep.subr.bf16.mxu0 %v2894_v4 }
 0x3c1   :  { %v532_v61 = vpop.f32.mrb[4].mxu1 }
 0x3c2   :  { %v533_v62 = vadd.f32 %v3094_v59, %v532_v61  ;;  %v2447_v63 = vpop.f32.mrb[5].mxu1  ;;  %v738_v61 = vld [vmem:[#allocation7 + $0x2] sm:$0x3] }
 0x3c3   :  { %v535_v0 = vpop.f32.mrb[6].mxu1 }
 0x3c4   :  { %v538_v1 = vadd.f32 %v533_v62, %v472_v60  ;;  %v2448_v2 = vpop.f32.mrb[7].mxu1 }
 0x3c6   :  { %539 = vst.msk [vmem:[#allocation7] sm:$0x3] %vm285_vm2, %v538_v1 }
 0x3c9   :  { %v639_v6 = vpop.f32.mrb[8].mxu1  ;;  %v595_v8 = vpop.f32.mrb[8].mxu0 }
 0x3ca   :  { %v645_v7 = vadd.f32 %v639_v6, %v604_v5  ;;  %v2463_v9 = vpop.f32.mrb[9].mxu1  ;;  %v601_v10 = vadd.f32 %v595_v8, %v541_v3  ;;  %v2455_v11 = vpop.f32.mrb[9].mxu0  ;;  %v789_v5 = vld [vmem:[#allocation7 + $0xc] sm:$0x3]  ;;  %v840_v6 = vld [vmem:[#allocation2 + $0x4] sm:$0x3] }
 0x3cb   :  { %v642_v12 = vpop.f32.mrb[10].mxu1  ;;  %v598_v13 = vpop.f32.mrb[10].mxu0 }
 0x3cc   :  { %2720 = vtanh.f32 %v645_v7  ;;  %v2464_v14 = vpop.f32.mrb[11].mxu1  ;;  %602 = vst.msk [vmem:[#allocation7 + $0xe] sm:$0x3] %vm285_vm2, %v601_v10  ;;  %v2456_v15 = vpop.f32.mrb[11].mxu0  ;;  %v2288_v25 = vmul.f32 -1.442695, %v645_v7 }
 0x3d1   :  { %v706_v17 = vpop.f32.mrb[12].mxu0 }
 0x3d2   :  { %v712_v18 = vadd.f32 %v706_v17, %v671_v16  ;;  %v2471_v19 = vpop.f32.mrb[13].mxu0  ;;  %v907_v17 = vld [vmem:[#allocation3 + $0xa] sm:$0x3] }
 0x3d3   :  { %v709_v20 = vpop.f32.mrb[14].mxu0 }
 0x3d4   :  { %2722 = vtanh.f32 %v712_v18  ;;  %v2472_v21 = vpop.f32.mrb[15].mxu0  ;;  %v2290_v26 = vmul.f32 -1.442695, %v712_v18 }
 0x3d5   :  { %2724 = vpow2.f32 %v2288_v25 }
 0x3d6   :  { %v2721_v22 = vpop.eup %2720  ;;  %2726 = vpow2.f32 %v2290_v26 }
 0x3d7   :  { %655 = vrot.lane.b32.xlu0 %v2721_v22, %s2897_s2 }
 0x3de   :  { %v2723_v24 = vpop.eup %2722 }
 0x3df   :  { %722 = vrot.lane.b32.xlu1 %v2723_v24, %s2897_s2  ;;  %v2725_v28 = vpop.eup %2724 }
 0x3e0   :  { %v649_v29 = vadd.f32 1.0, %v2725_v28  ;;  %v2727_v30 = vpop.eup %2726 }
 0x3e1   :  { %v716_v31 = vadd.f32 1.0, %v2727_v30 }
 0x3e2   :  { %2728 = vrcp.f32 %v649_v29 }
 0x3e3   :  { %2730 = vrcp.f32 %v716_v31 }
 0x3ec   :  { %v2729_v33 = vpop.eup %2728 }
 0x3ed   :  { %v2731_v37 = vpop.eup %2730  ;;  %v653_v40 = vmul.f32 %v2729_v33, %v3009_v41 }
 0x3ee   :  { %v720_v45 = vmul.f32 %v2731_v37, %v3012_v44 }
 0x449   :  { %v656_v35 = vpop.permute.xlu0 %655 }
 0x44a   :  { %v658_v36 = vmul.f32 %v2729_v33, %v656_v35 }
 0x44c   :  { %660 = vrot.lane.b32.xlu0 %v658_v36, %s2898_s9 }
 0x451   :  { %v723_v38 = vpop.permute.xlu1 %722 }
 0x452   :  { %v725_v39 = vmul.f32 %v2731_v37, %v723_v38 }
 0x454   :  { %727 = vrot.lane.b32.xlu1 %v725_v39, %s2898_s9 }
 0x4be   :  { %v661_v42 = vpop.permute.xlu0 %660 }
 0x4bf   :  { %v3104_v43 = vadd.f32 %v661_v42, %v653_v40 }
 0x4c1   :  { %2732 = vtanh.f32 %v3104_v43 }
 0x4c6   :  { %v728_v48 = vpop.permute.xlu1 %727 }
 0x4c7   :  { %v3108_v51 = vadd.f32 %v728_v48, %v720_v45 }
 0x4c9   :  { %2734 = vtanh.f32 %v3108_v51 }
 0x4cb   :  { %v2733_v52 = vpop.eup %2732 }
 0x4cc   :  { %666 = vrot.lane.b32.xlu0 %v2733_v52, %s2897_s2 }
 0x4d3   :  { %v2735_v53 = vpop.eup %2734 }
 0x4d4   :  { %733 = vrot.lane.b32.xlu1 %v2735_v53, %s2897_s2 }
 0x53e   :  { %v667_v54 = vpop.permute.xlu0 %666 }
 0x53f   :  { %v669_v41 = vmul.f32 %v2729_v33, %v667_v54 }
 0x541   :  { %v739_v55 = vpack.c.bf16 %v669_v41, %v669_v41 }
 0x543   :  { %741 = vrot.lane.b32.xlu0 %v739_v55, %s2898_s9 }
 0x546   :  { %v734_v56 = vpop.permute.xlu1 %733 }
 0x547   :  { %v736_v57 = vmul.f32 %v2731_v37, %v734_v56 }
 0x549   :  { %v790_v58 = vpack.c.bf16 %v736_v57, %v736_v57 }
 0x54b   :  { %792 = vrot.lane.b32.xlu1 %v790_v58, %s2898_s9 }
 0x5b5   :  { %v742_v44 = vpop.permute.xlu0 %741 }
 0x5b6   :  { %2478 = vmatmul.mubr.msk.bf16.vlgmr.msra.gmra.mrb[12].mxu1 %vm324_vm3, %v742_v44 }
 0x5b7   :  { %2490 = vmatpush3.bf16.msra.mxu1 %v2970_v23  ;;  %2493 = vmatprep.mubr.msk.bf16.mxu1 %vm2895_vm0, %v2894_v4 }
 0x5b8   :  { %2491 = vmatprep.subr.bf16.mxu1 %v2894_v4 }
 0x5bb   :  { %2492 = vmatpush3.bf16.msra.mxu1 %v2977_v27 }
 0x5bc   :  { %2505 = vmatprep.subr.bf16.mxu1 %v2894_v4 }
 0x5bd   :  { %v793_v60 = vpop.permute.xlu1 %792 }
 0x5be   :  { %2494 = vmatmul.mubr.msk.bf16.vlgmr.msra.gmra.mrb[16].mxu1 %vm324_vm3, %v742_v44  ;;  %2486 = vmatmul.mubr.msk.bf16.vlgmr.msra.gmra.mrb[16].mxu0 %vm324_vm3, %v793_v60 }
 0x5bf   :  { %2506 = vmatpush3.bf16.msra.mxu1 %v3019_v46  ;;  %2498 = vmatpush3.bf16.msra.mxu0 %v2984_v32 }
 0x5c0   :  { %2501 = vmatprep.mubr.msk.bf16.mxu0 %vm2895_vm0, %v2894_v4  ;;  %2499 = vmatprep.subr.bf16.mxu0 %v2894_v4 }
 0x5c1   :  { %2507 = vmatprep.subr.bf16.mxu1 %v2894_v4  ;;  %2509 = vmatprep.mubr.msk.bf16.mxu1 %vm2895_vm0, %v2894_v4 }
 0x5c3   :  { %2508 = vmatpush3.bf16.msra.mxu1 %v3025_v47  ;;  %2500 = vmatpush3.bf16.msra.mxu0 %v2993_v34 }
 0x5c4   :  { %2521 = vmatprep.subr.bf16.mxu1 %v2894_v4  ;;  %2513 = vmatprep.subr.bf16.mxu0 %v2894_v4 }
 0x5c6   :  { %2502 = vmatmul.mubr.msk.bf16.vlgmr.msra.gmra.mrb[20].mxu0 %vm324_vm3, %v793_v60 }
 0x5c7   :  { %2514 = vmatpush3.bf16.msra.mxu0 %v3034_v49  ;;  %2517 = vmatprep.mubr.msk.bf16.mxu0 %vm2895_vm0, %v2894_v4 }
 0x5c8   :  { %2515 = vmatprep.subr.bf16.mxu0 %v2894_v4 }
 0x5cb   :  { %2516 = vmatpush3.bf16.msra.mxu0 %v3040_v50 }
 0x5cc   :  { %2529 = vmatprep.subr.bf16.mxu0 %v2894_v4 }
 0x689   :  { %v780_v62 = vpop.f32.mrb[12].mxu1 }
 0x68a   :  { %v781_v63 = vadd.f32 %v3094_v59, %v780_v62  ;;  %v2479_v0 = vpop.f32.mrb[13].mxu1  ;;  %v974_v62 = vld [vmem:[#allocation7 + $0x4] sm:$0x3] }
 0x68b   :  { %v783_v1 = vpop.f32.mrb[14].mxu1 }
 0x68c   :  { %v786_v2 = vadd.f32 %v781_v63, %v738_v61  ;;  %v2480_v3 = vpop.f32.mrb[15].mxu1 }
 0x68e   :  { %787 = vst.msk [vmem:[#allocation7 + $0x2] sm:$0x3] %vm285_vm2, %v786_v2 }
 0x691   :  { %v875_v7 = vpop.f32.mrb[16].mxu1  ;;  %v831_v9 = vpop.f32.mrb[16].mxu0 }
 0x692   :  { %v881_v8 = vadd.f32 %v875_v7, %v840_v6  ;;  %v2495_v10 = vpop.f32.mrb[17].mxu1  ;;  %v837_v11 = vadd.f32 %v831_v9, %v789_v5  ;;  %v2487_v12 = vpop.f32.mrb[17].mxu0  ;;  %v1025_v6 = vld [vmem:[#allocation7 + $0xa] sm:$0x3]  ;;  %v1076_v7 = vld [vmem:[#allocation2 + $0x6] sm:$0x3] }
 0x693   :  { %v878_v13 = vpop.f32.mrb[18].mxu1  ;;  %v834_v14 = vpop.f32.mrb[18].mxu0 }
 0x694   :  { %2736 = vtanh.f32 %v881_v8  ;;  %v2496_v15 = vpop.f32.mrb[19].mxu1  ;;  %838 = vst.msk [vmem:[#allocation7 + $0xc] sm:$0x3] %vm285_vm2, %v837_v11  ;;  %v2488_v16 = vpop.f32.mrb[19].mxu0  ;;  %v2294_v26 = vmul.f32 -1.442695, %v881_v8 }
 0x699   :  { %v942_v18 = vpop.f32.mrb[20].mxu0 }
 0x69a   :  { %v948_v19 = vadd.f32 %v942_v18, %v907_v17  ;;  %v2503_v20 = vpop.f32.mrb[21].mxu0  ;;  %v1143_v18 = vld [vmem:[#allocation3 + $0x8] sm:$0x3] }
 0x69b   :  { %v945_v21 = vpop.f32.mrb[22].mxu0 }
 0x69c   :  { %2738 = vtanh.f32 %v948_v19  ;;  %v2504_v22 = vpop.f32.mrb[23].mxu0  ;;  %v2296_v28 = vmul.f32 -1.442695, %v948_v19 }
 0x69d   :  { %2740 = vpow2.f32 %v2294_v26 }
 0x69e   :  { %v2737_v24 = vpop.eup %2736  ;;  %2742 = vpow2.f32 %v2296_v28 }
 0x69f   :  { %891 = vrot.lane.b32.xlu0 %v2737_v24, %s2897_s2 }
 0x6a6   :  { %v2739_v25 = vpop.eup %2738 }
 0x6a7   :  { %958 = vrot.lane.b32.xlu1 %v2739_v25, %s2897_s2  ;;  %v2741_v29 = vpop.eup %2740 }
 0x6a8   :  { %v885_v30 = vadd.f32 1.0, %v2741_v29  ;;  %v2743_v31 = vpop.eup %2742 }
 0x6a9   :  { %v952_v33 = vadd.f32 1.0, %v2743_v31 }
 0x6aa   :  { %2744 = vrcp.f32 %v885_v30 }
 0x6ab   :  { %2746 = vrcp.f32 %v952_v33 }
 0x6b4   :  { %v2745_v35 = vpop.eup %2744 }
 0x6b5   :  { %v2747_v38 = vpop.eup %2746  ;;  %v889_v42 = vmul.f32 %v2745_v35, %v3104_v43 }
 0x6b6   :  { %v956_v52 = vmul.f32 %v2747_v38, %v3108_v51 }
 0x711   :  { %v892_v36 = vpop.permute.xlu0 %891 }
 0x712   :  { %v894_v37 = vmul.f32 %v2745_v35, %v892_v36 }
 0x714   :  { %896 = vrot.lane.b32.xlu0 %v894_v37, %s2898_s9 }
 0x719   :  { %v959_v39 = vpop.permute.xlu1 %958 }
 0x71a   :  { %v961_v40 = vmul.f32 %v2747_v38, %v959_v39 }
 0x71c   :  { %963 = vrot.lane.b32.xlu1 %v961_v40, %s2898_s9 }
 0x786   :  { %v897_v45 = vpop.permute.xlu0 %896 }
 0x787   :  { %v3151_v48 = vadd.f32 %v897_v45, %v889_v42 }
 0x789   :  { %2748 = vtanh.f32 %v3151_v48 }
 0x78e   :  { %v964_v53 = vpop.permute.xlu1 %963 }
 0x78f   :  { %v3155_v54 = vadd.f32 %v964_v53, %v956_v52 }
 0x791   :  { %2750 = vtanh.f32 %v3155_v54 }
 0x793   :  { %v2749_v41 = vpop.eup %2748 }
 0x794   :  { %902 = vrot.lane.b32.xlu0 %v2749_v41, %s2897_s2 }
 0x79b   :  { %v2751_v55 = vpop.eup %2750 }
 0x79c   :  { %969 = vrot.lane.b32.xlu1 %v2751_v55, %s2897_s2 }
 0x806   :  { %v903_v56 = vpop.permute.xlu0 %902 }
 0x807   :  { %v905_v43 = vmul.f32 %v2745_v35, %v903_v56 }
 0x809   :  { %v975_v57 = vpack.c.bf16 %v905_v43, %v905_v43 }
 0x80b   :  { %977 = vrot.lane.b32.xlu0 %v975_v57, %s2898_s9 }
 0x80e   :  { %v970_v58 = vpop.permute.xlu1 %969 }
 0x80f   :  { %v972_v44 = vmul.f32 %v2747_v38, %v970_v58 }
 0x811   :  { %v1026_v60 = vpack.c.bf16 %v972_v44, %v972_v44 }
 0x813   :  { %1028 = vrot.lane.b32.xlu1 %v1026_v60, %s2898_s9 }
 0x87d   :  { %v978_v51 = vpop.permute.xlu0 %977 }
 0x87e   :  { %2510 = vmatmul.mubr.msk.bf16.vlgmr.msra.gmra.mrb[20].mxu1 %vm324_vm3, %v978_v51 }
 0x87f   :  { %2522 = vmatpush3.bf16.msra.mxu1 %v2970_v23  ;;  %2525 = vmatprep.mubr.msk.bf16.mxu1 %vm2895_vm0, %v2894_v4 }
 0x880   :  { %2523 = vmatprep.subr.bf16.mxu1 %v2894_v4 }
 0x883   :  { %2524 = vmatpush3.bf16.msra.mxu1 %v2977_v27 }
 0x884   :  { %2537 = vmatprep.subr.bf16.mxu1 %v2894_v4 }
 0x885   :  { %v1029_v61 = vpop.permute.xlu1 %1028 }
 0x886   :  { %2526 = vmatmul.mubr.msk.bf16.vlgmr.msra.gmra.mrb[24].mxu1 %vm324_vm3, %v978_v51  ;;  %2518 = vmatmul.mubr.msk.bf16.vlgmr.msra.gmra.mrb[24].mxu0 %vm324_vm3, %v1029_v61 }
 0x887   :  { %2538 = vmatpush3.bf16.msra.mxu1 %v3019_v46  ;;  %2530 = vmatpush3.bf16.msra.mxu0 %v2984_v32 }
 0x888   :  { %2533 = vmatprep.mubr.msk.bf16.mxu0 %vm2895_vm0, %v2894_v4  ;;  %2531 = vmatprep.subr.bf16.mxu0 %v2894_v4 }
 0x889   :  { %2539 = vmatprep.subr.bf16.mxu1 %v2894_v4  ;;  %2541 = vmatprep.mubr.msk.bf16.mxu1 %vm2895_vm0, %v2894_v4 }
 0x88b   :  { %2540 = vmatpush3.bf16.msra.mxu1 %v3025_v47  ;;  %2532 = vmatpush3.bf16.msra.mxu0 %v2993_v34 }
 0x88c   :  { %2553 = vmatprep.subr.bf16.mxu1 %v2894_v4  ;;  %2545 = vmatprep.subr.bf16.mxu0 %v2894_v4 }
 0x88e   :  { %2534 = vmatmul.mubr.msk.bf16.vlgmr.msra.gmra.mrb[28].mxu0 %vm324_vm3, %v1029_v61 }
 0x88f   :  { %2546 = vmatpush3.bf16.msra.mxu0 %v3034_v49  ;;  %2549 = vmatprep.mubr.msk.bf16.mxu0 %vm2895_vm0, %v2894_v4 }
 0x890   :  { %2547 = vmatprep.subr.bf16.mxu0 %v2894_v4 }
 0x893   :  { %2548 = vmatpush3.bf16.msra.mxu0 %v3040_v50 }
 0x894   :  { %2561 = vmatprep.subr.bf16.mxu0 %v2894_v4 }
 0x951   :  { %v1016_v63 = vpop.f32.mrb[20].mxu1 }
 0x952   :  { %v1017_v0 = vadd.f32 %v3094_v59, %v1016_v63  ;;  %v2511_v1 = vpop.f32.mrb[21].mxu1 }
 0x953   :  { %v1019_v2 = vpop.f32.mrb[22].mxu1 }
 0x954   :  { %v1022_v3 = vadd.f32 %v1017_v0, %v974_v62  ;;  %v2512_v5 = vpop.f32.mrb[23].mxu1  ;;  %v1261_v2 = vld [vmem:[#allocation7 + $0x8] sm:$0x3] }
 0x956   :  { %1023 = vst.msk [vmem:[#allocation7 + $0x4] sm:$0x3] %vm285_vm2, %v1022_v3  ;;  %v1312_v3 = vld [vmem:[#allocation2 + $0x8] sm:$0x3] }
 0x959   :  { %v1111_v8 = vpop.f32.mrb[24].mxu1  ;;  %v1067_v10 = vpop.f32.mrb[24].mxu0 }
 0x95a   :  { %v1117_v9 = vadd.f32 %v1111_v8, %v1076_v7  ;;  %v2527_v11 = vpop.f32.mrb[25].mxu1  ;;  %v1073_v12 = vadd.f32 %v1067_v10, %v1025_v6  ;;  %v2519_v13 = vpop.f32.mrb[25].mxu0 }
 0x95b   :  { %v1114_v14 = vpop.f32.mrb[26].mxu1  ;;  %v1070_v15 = vpop.f32.mrb[26].mxu0 }
 0x95c   :  { %2752 = vtanh.f32 %v1117_v9  ;;  %v2528_v16 = vpop.f32.mrb[27].mxu1  ;;  %1074 = vst.msk [vmem:[#allocation7 + $0xa] sm:$0x3] %vm285_vm2, %v1073_v12  ;;  %v2520_v17 = vpop.f32.mrb[27].mxu0  ;;  %v2300_v28 = vmul.f32 -1.442695, %v1117_v9 }
 0x95d   :  { %v1379_v15 = vld [vmem:[#allocation3 + $0x6] sm:$0x3] }
 0x961   :  { %v1178_v19 = vpop.f32.mrb[28].mxu0 }
 0x962   :  { %v1184_v20 = vadd.f32 %v1178_v19, %v1143_v18  ;;  %v2535_v21 = vpop.f32.mrb[29].mxu0 }
 0x963   :  { %v1181_v22 = vpop.f32.mrb[30].mxu0 }
 0x964   :  { %2754 = vtanh.f32 %v1184_v20  ;;  %v2536_v24 = vpop.f32.mrb[31].mxu0  ;;  %v2302_v29 = vmul.f32 -1.442695, %v1184_v20 }
 0x965   :  { %2756 = vpow2.f32 %v2300_v28 }
 0x966   :  { %v2753_v25 = vpop.eup %2752  ;;  %2758 = vpow2.f32 %v2302_v29 }
 0x967   :  { %1127 = vrot.lane.b32.xlu0 %v2753_v25, %s2897_s2 }
 0x96e   :  { %v2755_v26 = vpop.eup %2754 }
 0x96f   :  { %1194 = vrot.lane.b32.xlu1 %v2755_v26, %s2897_s2  ;;  %v2757_v30 = vpop.eup %2756 }
 0x970   :  { %v1121_v31 = vadd.f32 1.0, %v2757_v30  ;;  %v2759_v33 = vpop.eup %2758 }
 0x971   :  { %v1188_v35 = vadd.f32 1.0, %v2759_v33 }
 0x972   :  { %2760 = vrcp.f32 %v1121_v31 }
 0x973   :  { %2762 = vrcp.f32 %v1188_v35 }
 0x97c   :  { %v2761_v36 = vpop.eup %2760 }
 0x97d   :  { %v2763_v39 = vpop.eup %2762  ;;  %v1125_v45 = vmul.f32 %v2761_v36, %v3151_v48 }
 0x97e   :  { %v1192_v41 = vmul.f32 %v2763_v39, %v3155_v54 }
 0x9d9   :  { %v1128_v37 = vpop.permute.xlu0 %1127 }
 0x9da   :  { %v1130_v38 = vmul.f32 %v2761_v36, %v1128_v37 }
 0x9dc   :  { %1132 = vrot.lane.b32.xlu0 %v1130_v38, %s2898_s9 }
 0x9e1   :  { %v1195_v40 = vpop.permute.xlu1 %1194 }
 0x9e2   :  { %v1197_v42 = vmul.f32 %v2763_v39, %v1195_v40 }
 0x9e4   :  { %1199 = vrot.lane.b32.xlu1 %v1197_v42, %s2898_s9 }
 0xa4e   :  { %v1133_v52 = vpop.permute.xlu0 %1132 }
 0xa4f   :  { %v3198_v53 = vadd.f32 %v1133_v52, %v1125_v45 }
 0xa51   :  { %2764 = vtanh.f32 %v3198_v53 }
 0xa56   :  { %v1200_v55 = vpop.permute.xlu1 %1199 }
 0xa57   :  { %v3202_v56 = vadd.f32 %v1200_v55, %v1192_v41 }
 0xa59   :  { %2766 = vtanh.f32 %v3202_v56 }
 0xa5b   :  { %v2765_v43 = vpop.eup %2764 }
 0xa5c   :  { %1138 = vrot.lane.b32.xlu0 %v2765_v43, %s2897_s2 }
 0xa63   :  { %v2767_v57 = vpop.eup %2766 }
 0xa64   :  { %1205 = vrot.lane.b32.xlu1 %v2767_v57, %s2897_s2 }
 0xace   :  { %v1139_v58 = vpop.permute.xlu0 %1138 }
 0xacf   :  { %v1141_v48 = vmul.f32 %v2761_v36, %v1139_v58 }
 0xad1   :  { %v1211_v44 = vpack.c.bf16 %v1141_v48, %v1141_v48 }
 0xad3   :  { %1213 = vrot.lane.b32.xlu0 %v1211_v44, %s2898_s9 }
 0xad6   :  { %v1206_v60 = vpop.permute.xlu1 %1205 }
 0xad7   :  { %v1208_v51 = vmul.f32 %v2763_v39, %v1206_v60 }
 0xad9   :  { %v1262_v61 = vpack.c.bf16 %v1208_v51, %v1208_v51  ;;  %v3260_v51 = vld [vmem:[%s3456_s3] sm:$0xff]  }
 0xadb   :  { %1264 = vrot.lane.b32.xlu1 %v1262_v61, %s2898_s9  ;;  %v3269_v61 = vld [vmem:[%s3456_s3 + $0x8] sm:$0xff]  }
 0xb45   :  { %v1214_v54 = vpop.permute.xlu0 %1213 }
 0xb46   :  { %2542 = vmatmul.mubr.msk.bf16.vlgmr.msra.gmra.mrb[28].mxu1 %vm324_vm3, %v1214_v54 }
 0xb47   :  { %2554 = vmatpush3.bf16.msra.mxu1 %v2970_v23  ;;  %2557 = vmatprep.mubr.msk.bf16.mxu1 %vm2895_vm0, %v2894_v4  ;;  %v1210_v23 = vld [vmem:[#allocation7 + $0x6] sm:$0x3] }
 0xb48   :  { %2555 = vmatprep.subr.bf16.mxu1 %v2894_v4 }
 0xb4b   :  { %2556 = vmatpush3.bf16.msra.mxu1 %v2977_v27 }
 0xb4c   :  { %2569 = vmatprep.subr.bf16.mxu1 %v2894_v4 }
 0xb4d   :  { %v1265_v62 = vpop.permute.xlu1 %1264 }
 0xb4e   :  { %2558 = vmatmul.mubr.msk.bf16.vlgmr.msra.gmra.mrb[32].mxu1 %vm324_vm3, %v1214_v54  ;;  %2550 = vmatmul.mubr.msk.bf16.vlgmr.msra.gmra.mrb[32].mxu0 %vm324_vm3, %v1265_v62 }
 0xb4f   :  { %2570 = vmatpush3.bf16.msra.mxu1 %v3019_v46  ;;  %2562 = vmatpush3.bf16.msra.mxu0 %v2984_v32 }
 0xb50   :  { %2565 = vmatprep.mubr.msk.bf16.mxu0 %vm2895_vm0, %v2894_v4  ;;  %2563 = vmatprep.subr.bf16.mxu0 %v2894_v4 }
 0xb51   :  { %2571 = vmatprep.subr.bf16.mxu1 %v2894_v4  ;;  %2573 = vmatprep.mubr.msk.bf16.mxu1 %vm2895_vm0, %v2894_v4 }
 0xb53   :  { %2572 = vmatpush3.bf16.msra.mxu1 %v3025_v47  ;;  %2564 = vmatpush3.bf16.msra.mxu0 %v2993_v34 }
 0xb54   :  { %2585 = vmatprep.subr.bf16.mxu1 %v2894_v4  ;;  %2577 = vmatprep.subr.bf16.mxu0 %v2894_v4 }
 0xb56   :  { %2566 = vmatmul.mubr.msk.bf16.vlgmr.msra.gmra.mrb[36].mxu0 %vm324_vm3, %v1265_v62  ;;  %v3279_v62 = vld [vmem:[%s3457_s4] sm:$0xff]  }
 0xb57   :  { %2578 = vmatpush3.bf16.msra.mxu0 %v3034_v49  ;;  %2581 = vmatprep.mubr.msk.bf16.mxu0 %vm2895_vm0, %v2894_v4 }
 0xb58   :  { %2579 = vmatprep.subr.bf16.mxu0 %v2894_v4 }
 0xb5b   :  { %2580 = vmatpush3.bf16.msra.mxu0 %v3040_v50 }
 0xb5c   :  { %2593 = vmatprep.subr.bf16.mxu0 %v2894_v4 }
 0xc19   :  { %v1252_v27 = vpop.f32.mrb[28].mxu1 }
 0xc1a   :  { %v1253_v32 = vadd.f32 %v3094_v59, %v1252_v27  ;;  %v2543_v34 = vpop.f32.mrb[29].mxu1 }
 0xc1b   :  { %v1255_v63 = vpop.f32.mrb[30].mxu1 }
 0xc1c   :  { %v1258_v0 = vadd.f32 %v1253_v32, %v1210_v23  ;;  %v2544_v1 = vpop.f32.mrb[31].mxu1 }
 0xc1e   :  { %1259 = vst.msk [vmem:[#allocation7 + $0x6] sm:$0x3] %vm285_vm2, %v1258_v0 }
 0xc21   :  { %v1347_v5 = vpop.f32.mrb[32].mxu1  ;;  %v1303_v7 = vpop.f32.mrb[32].mxu0 }
 0xc22   :  { %v1353_v6 = vadd.f32 %v1347_v5, %v1312_v3  ;;  %v2559_v8 = vpop.f32.mrb[33].mxu1  ;;  %v1309_v9 = vadd.f32 %v1303_v7, %v1261_v2  ;;  %v2551_v10 = vpop.f32.mrb[33].mxu0 }
 0xc23   :  { %v1350_v11 = vpop.f32.mrb[34].mxu1  ;;  %v1306_v12 = vpop.f32.mrb[34].mxu0 }
 0xc24   :  { %2768 = vtanh.f32 %v1353_v6  ;;  %v2560_v13 = vpop.f32.mrb[35].mxu1  ;;  %1310 = vst.msk [vmem:[#allocation7 + $0x8] sm:$0x3] %vm285_vm2, %v1309_v9  ;;  %v2552_v14 = vpop.f32.mrb[35].mxu0  ;;  %v2306_v24 = vmul.f32 -1.442695, %v1353_v6 }
 0xc25   :  { %v1495_v3 = vld [vmem:[#allocation7 + $0x6] sm:$0x3]  ;;  %v1613_v12 = vld [vmem:[#allocation3 + $0x4] sm:$0x3] }
 0xc29   :  { %v1414_v16 = vpop.f32.mrb[36].mxu0 }
 0xc2a   :  { %v1420_v17 = vadd.f32 %v1414_v16, %v1379_v15  ;;  %v2567_v18 = vpop.f32.mrb[37].mxu0 }
 0xc2b   :  { %v1417_v19 = vpop.f32.mrb[38].mxu0  ;;  %v1445_v32 = vld [vmem:[#allocation7 + $0x8] sm:$0x3] }
 0xc2c   :  { %2770 = vtanh.f32 %v1420_v17  ;;  %v2568_v20 = vpop.f32.mrb[39].mxu0  ;;  %v2308_v25 = vmul.f32 -1.442695, %v1420_v17 }
 0xc2d   :  { %2772 = vpow2.f32 %v2306_v24 }
 0xc2e   :  { %v2769_v21 = vpop.eup %2768  ;;  %2774 = vpow2.f32 %v2308_v25 }
 0xc2f   :  { %1363 = vrot.lane.b32.xlu0 %v2769_v21, %s2897_s2 }
 0xc36   :  { %v2771_v22 = vpop.eup %2770 }
 0xc37   :  { %1430 = vrot.lane.b32.xlu1 %v2771_v22, %s2897_s2  ;;  %v2773_v26 = vpop.eup %2772 }
 0xc38   :  { %v1357_v28 = vadd.f32 1.0, %v2773_v26  ;;  %v2775_v29 = vpop.eup %2774 }
 0xc39   :  { %v1424_v30 = vadd.f32 1.0, %v2775_v29 }
 0xc3a   :  { %2776 = vrcp.f32 %v1357_v28 }
 0xc3b   :  { %2778 = vrcp.f32 %v1424_v30 }
 0xc44   :  { %v2777_v31 = vpop.eup %2776 }
 0xc45   :  { %v2779_v36 = vpop.eup %2778  ;;  %v1361_v39 = vmul.f32 %v2777_v31, %v3198_v53 }
 0xc46   :  { %v1428_v45 = vmul.f32 %v2779_v36, %v3202_v56 }
 0xca1   :  { %v1364_v33 = vpop.permute.xlu0 %1363 }
 0xca2   :  { %v1366_v35 = vmul.f32 %v2777_v31, %v1364_v33 }
 0xca4   :  { %1368 = vrot.lane.b32.xlu0 %v1366_v35, %s2898_s9 }
 0xca9   :  { %v1431_v37 = vpop.permute.xlu1 %1430 }
 0xcaa   :  { %v1433_v38 = vmul.f32 %v2779_v36, %v1431_v37 }
 0xcac   :  { %1435 = vrot.lane.b32.xlu1 %v1433_v38, %s2898_s9 }
 0xd16   :  { %v1369_v40 = vpop.permute.xlu0 %1368 }
 0xd17   :  { %v3245_v42 = vadd.f32 %v1369_v40, %v1361_v39 }
 0xd19   :  { %2780 = vtanh.f32 %v3245_v42 }
 0xd1e   :  { %v1436_v52 = vpop.permute.xlu1 %1435 }
 0xd1f   :  { %v3249_v41 = vadd.f32 %v1436_v52, %v1428_v45 }
 0xd21   :  { %2782 = vtanh.f32 %v3249_v41 }
 0xd23   :  { %v2781_v55 = vpop.eup %2780 }
 0xd24   :  { %1374 = vrot.lane.b32.xlu0 %v2781_v55, %s2897_s2 }
 0xd2b   :  { %v2783_v43 = vpop.eup %2782 }
 0xd2c   :  { %1441 = vrot.lane.b32.xlu1 %v2783_v43, %s2897_s2 }
 0xd96   :  { %v1375_v57 = vpop.permute.xlu0 %1374 }
 0xd97   :  { %v1377_v53 = vmul.f32 %v2777_v31, %v1375_v57 }
 0xd99   :  { %v1446_v58 = vpack.c.bf16 %v1377_v53, %v1377_v53 }
 0xd9b   :  { %1448 = vrot.lane.b32.xlu0 %v1446_v58, %s2898_s9 }
 0xd9e   :  { %v1442_v48 = vpop.permute.xlu1 %1441 }
 0xd9f   :  { %v1444_v44 = vmul.f32 %v2779_v36, %v1442_v48 }
 0xda1   :  { %v1496_v60 = vpack.c.bf16 %v1444_v44, %v1444_v44 }
 0xda3   :  { %1498 = vrot.lane.b32.xlu1 %v1496_v60, %s2898_s9  ;;  %v3335_v60 = vld [vmem:[%s3458_s5] sm:$0xff]  }
 0xe0d   :  { %v1449_v56 = vpop.permute.xlu0 %1448 }
 0xe0e   :  { %2574 = vmatmul.mubr.msk.bf16.vlgmr.msra.gmra.mrb[36].mxu1 %vm324_vm3, %v1449_v56 }
 0xe0f   :  { %2586 = vmatpush3.bf16.msra.mxu1 %v3260_v51  ;;  %2589 = vmatprep.mubr.msk.bf16.mxu1 %vm2895_vm0, %v2894_v4 }
 0xe10   :  { %2587 = vmatprep.subr.bf16.mxu1 %v2894_v4 }
 0xe13   :  { %2588 = vmatpush3.bf16.msra.mxu1 %v3269_v61 }
 0xe14   :  { %2601 = vmatprep.subr.bf16.mxu1 %v2894_v4 }
 0xe15   :  { %v1499_v54 = vpop.permute.xlu1 %1498 }
 0xe16   :  { %2590 = vmatmul.mubr.msk.bf16.vlgmr.msra.gmra.mrb[40].mxu1 %vm324_vm3, %v1449_v56  ;;  %2582 = vmatmul.mubr.msk.bf16.vlgmr.msra.gmra.mrb[40].mxu0 %vm324_vm3, %v1499_v54  ;;  %v3348_v56 = vld [vmem:[%s3458_s5 + $0x8] sm:$0xff]  }
 0xe17   :  { %2602 = vmatpush3.bf16.msra.mxu1 %v3019_v46  ;;  %2594 = vmatpush3.bf16.msra.mxu0 %v3279_v62  ;;  %v3292_v46 = vld [vmem:[%s3457_s4 + $0x8] sm:$0xff]  }
 0xe18   :  { %2597 = vmatprep.mubr.msk.bf16.mxu0 %vm2895_vm0, %v2894_v4  ;;  %2595 = vmatprep.subr.bf16.mxu0 %v2894_v4 }
 0xe19   :  { %2603 = vmatprep.subr.bf16.mxu1 %v2894_v4  ;;  %2605 = vmatprep.mubr.msk.bf16.mxu1 %vm2895_vm0, %v2894_v4 }
 0xe1b   :  { %2604 = vmatpush3.bf16.msra.mxu1 %v3025_v47  ;;  %2596 = vmatpush3.bf16.msra.mxu0 %v3292_v46 }
 0xe1c   :  { %2617 = vmatprep.subr.bf16.mxu1 %v2894_v4  ;;  %2609 = vmatprep.subr.bf16.mxu0 %v2894_v4 }
 0xe1e   :  { %2598 = vmatmul.mubr.msk.bf16.vlgmr.msra.gmra.mrb[44].mxu0 %vm324_vm3, %v1499_v54  ;;  %v3358_v54 = vld [vmem:[%s3459_s6] sm:$0xff]  }
 0xe1f   :  { %2610 = vmatpush3.bf16.msra.mxu0 %v3034_v49  ;;  %2613 = vmatprep.mubr.msk.bf16.mxu0 %vm2895_vm0, %v2894_v4  ;;  %v1546_v49 = vld [vmem:[#allocation2 + $0xa] sm:$0x3] }
 0xe20   :  { %2611 = vmatprep.subr.bf16.mxu0 %v2894_v4 }
 0xe23   :  { %2612 = vmatpush3.bf16.msra.mxu0 %v3040_v50 }
 0xe24   :  { %2625 = vmatprep.subr.bf16.mxu0 %v2894_v4 }
 0xee1   :  { %v1487_v47 = vpop.f32.mrb[36].mxu1 }
 0xee2   :  { %v1488_v23 = vadd.f32 %v3094_v59, %v1487_v47  ;;  %v2575_v27 = vpop.f32.mrb[37].mxu1  ;;  %v3367_v47 = vld [vmem:[%s3459_s6 + $0x8] sm:$0xff]  }
 0xee3   :  { %v1490_v34 = vpop.f32.mrb[38].mxu1 }
 0xee4   :  { %v1493_v63 = vadd.f32 %v1488_v23, %v1445_v32  ;;  %v2576_v0 = vpop.f32.mrb[39].mxu1  ;;  %v1679_v34 = vld [vmem:[#allocation7 + $0xa] sm:$0x3] }
 0xee6   :  { %1494 = vst.msk [vmem:[#allocation7 + $0x8] sm:$0x3] %vm285_vm2, %v1493_v63 }
 0xee9   :  { %v1581_v1 = vpop.f32.mrb[40].mxu1  ;;  %v1537_v5 = vpop.f32.mrb[40].mxu0 }
 0xeea   :  { %v1587_v2 = vadd.f32 %v1581_v1, %v1546_v49  ;;  %v2591_v6 = vpop.f32.mrb[41].mxu1  ;;  %v1543_v7 = vadd.f32 %v1537_v5, %v1495_v3  ;;  %v2583_v50 = vpop.f32.mrb[41].mxu0  ;;  %v1780_v1 = vld [vmem:[#allocation2 + $0xc] sm:$0x3] }
 0xeeb   :  { %v1584_v8 = vpop.f32.mrb[42].mxu1  ;;  %v1540_v9 = vpop.f32.mrb[42].mxu0  ;;  %v1729_v5 = vld [vmem:[#allocation7 + $0x4] sm:$0x3] }
 0xeec   :  { %2784 = vtanh.f32 %v1587_v2  ;;  %v2592_v10 = vpop.f32.mrb[43].mxu1  ;;  %1544 = vst.msk [vmem:[#allocation7 + $0x6] sm:$0x3] %vm285_vm2, %v1543_v7  ;;  %v2584_v11 = vpop.f32.mrb[43].mxu0  ;;  %v2312_v20 = vmul.f32 -1.442695, %v1587_v2 }
 0xef1   :  { %v1648_v13 = vpop.f32.mrb[44].mxu0 }
 0xef2   :  { %v1654_v14 = vadd.f32 %v1648_v13, %v1613_v12  ;;  %v2599_v15 = vpop.f32.mrb[45].mxu0  ;;  %v1847_v12 = vld [vmem:[#allocation3 + $0x2] sm:$0x3] }
 0xef3   :  { %v1651_v16 = vpop.f32.mrb[46].mxu0 }
 0xef4   :  { %2786 = vtanh.f32 %v1654_v14  ;;  %v2600_v17 = vpop.f32.mrb[47].mxu0  ;;  %v2314_v21 = vmul.f32 -1.442695, %v1654_v14 }
 0xef5   :  { %2788 = vpow2.f32 %v2312_v20 }
 0xef6   :  { %v2785_v18 = vpop.eup %2784  ;;  %2790 = vpow2.f32 %v2314_v21 }
 0xef7   :  { %1597 = vrot.lane.b32.xlu0 %v2785_v18, %s2897_s2 }
 0xefe   :  { %v2787_v19 = vpop.eup %2786 }
 0xeff   :  { %1664 = vrot.lane.b32.xlu1 %v2787_v19, %s2897_s2  ;;  %v2789_v22 = vpop.eup %2788 }
 0xf00   :  { %v1591_v24 = vadd.f32 1.0, %v2789_v22  ;;  %v2791_v25 = vpop.eup %2790 }
 0xf01   :  { %v1658_v26 = vadd.f32 1.0, %v2791_v25 }
 0xf02   :  { %2792 = vrcp.f32 %v1591_v24 }
 0xf03   :  { %2794 = vrcp.f32 %v1658_v26 }
 0xf0c   :  { %v2793_v28 = vpop.eup %2792 }
 0xf0d   :  { %v2795_v31 = vpop.eup %2794  ;;  %v1595_v36 = vmul.f32 %v2793_v28, %v3245_v42 }
 0xf0e   :  { %v1662_v39 = vmul.f32 %v2795_v31, %v3249_v41 }
 0xf69   :  { %v1598_v29 = vpop.permute.xlu0 %1597 }
 0xf6a   :  { %v1600_v30 = vmul.f32 %v2793_v28, %v1598_v29 }
 0xf6c   :  { %1602 = vrot.lane.b32.xlu0 %v1600_v30, %s2898_s9 }
 0xf71   :  { %v1665_v33 = vpop.permute.xlu1 %1664 }
 0xf72   :  { %v1667_v35 = vmul.f32 %v2795_v31, %v1665_v33 }
 0xf74   :  { %1669 = vrot.lane.b32.xlu1 %v1667_v35, %s2898_s9 }
 0xfde   :  { %v1603_v37 = vpop.permute.xlu0 %1602 }
 0xfdf   :  { %v3312_v38 = vadd.f32 %v1603_v37, %v1595_v36 }
 0xfe1   :  { %2796 = vtanh.f32 %v3312_v38 }
 0xfe6   :  { %v1670_v40 = vpop.permute.xlu1 %1669 }
 0xfe7   :  { %v3316_v45 = vadd.f32 %v1670_v40, %v1662_v39 }
 0xfe9   :  { %2798 = vtanh.f32 %v3316_v45 }
 0xfeb   :  { %v2797_v52 = vpop.eup %2796 }
 0xfec   :  { %1608 = vrot.lane.b32.xlu0 %v2797_v52, %s2897_s2 }
 0xff3   :  { %v2799_v55 = vpop.eup %2798 }
 0xff4   :  { %1675 = vrot.lane.b32.xlu1 %v2799_v55, %s2897_s2 }
0x105e   :  { %v1609_v43 = vpop.permute.xlu0 %1608 }
0x105f   :  { %v1611_v42 = vmul.f32 %v2793_v28, %v1609_v43 }
0x1061   :  { %v1680_v57 = vpack.c.bf16 %v1611_v42, %v1611_v42 }
0x1063   :  { %1682 = vrot.lane.b32.xlu0 %v1680_v57, %s2898_s9 }
0x1066   :  { %v1676_v53 = vpop.permute.xlu1 %1675 }
0x1067   :  { %v1678_v58 = vmul.f32 %v2795_v31, %v1676_v53 }
0x1069   :  { %v1730_v48 = vpack.c.bf16 %v1678_v58, %v1678_v58 }
0x106b   :  { %1732 = vrot.lane.b32.xlu1 %v1730_v48, %s2898_s9 }
0x10d5   :  { %v1683_v41 = vpop.permute.xlu0 %1682 }
0x10d6   :  { %2606 = vmatmul.mubr.msk.bf16.vlgmr.msra.gmra.mrb[44].mxu1 %vm324_vm3, %v1683_v41 }
0x10d7   :  { %2618 = vmatpush3.bf16.msra.mxu1 %v3260_v51  ;;  %2621 = vmatprep.mubr.msk.bf16.mxu1 %vm2895_vm0, %v2894_v4 }
0x10d8   :  { %2619 = vmatprep.subr.bf16.mxu1 %v2894_v4 }
0x10db   :  { %2620 = vmatpush3.bf16.msra.mxu1 %v3269_v61 }
0x10dc   :  { %2633 = vmatprep.subr.bf16.mxu1 %v2894_v4 }
0x10dd   :  { %v1733_v44 = vpop.permute.xlu1 %1732 }
0x10de   :  { %2622 = vmatmul.mubr.msk.bf16.vlgmr.msra.gmra.mrb[48].mxu1 %vm324_vm3, %v1683_v41  ;;  %2614 = vmatmul.mubr.msk.bf16.vlgmr.msra.gmra.mrb[48].mxu0 %vm324_vm3, %v1733_v44 }
0x10df   :  { %2634 = vmatpush3.bf16.msra.mxu1 %v3335_v60  ;;  %2626 = vmatpush3.bf16.msra.mxu0 %v3279_v62 }
0x10e0   :  { %2629 = vmatprep.mubr.msk.bf16.mxu0 %vm2895_vm0, %v2894_v4  ;;  %2627 = vmatprep.subr.bf16.mxu0 %v2894_v4 }
0x10e1   :  { %2635 = vmatprep.subr.bf16.mxu1 %v2894_v4  ;;  %2637 = vmatprep.mubr.msk.bf16.mxu1 %vm2895_vm0, %v2894_v4 }
0x10e3   :  { %2636 = vmatpush3.bf16.msra.mxu1 %v3348_v56  ;;  %2628 = vmatpush3.bf16.msra.mxu0 %v3292_v46 }
0x10e4   :  { %2649 = vmatprep.subr.bf16.mxu1 %v2894_v4  ;;  %2641 = vmatprep.subr.bf16.mxu0 %v2894_v4 }
0x10e6   :  { %2630 = vmatmul.mubr.msk.bf16.vlgmr.msra.gmra.mrb[52].mxu0 %vm324_vm3, %v1733_v44 }
0x10e7   :  { %2642 = vmatpush3.bf16.msra.mxu0 %v3358_v54  ;;  %2645 = vmatprep.mubr.msk.bf16.mxu0 %vm2895_vm0, %v2894_v4 }
0x10e8   :  { %2643 = vmatprep.subr.bf16.mxu0 %v2894_v4 }
0x10eb   :  { %2644 = vmatpush3.bf16.msra.mxu0 %v3367_v47 }
0x10ec   :  { %2657 = vmatprep.subr.bf16.mxu0 %v2894_v4 }
0x11a9   :  { %v1721_v23 = vpop.f32.mrb[44].mxu1 }
0x11aa   :  { %v1722_v27 = vadd.f32 %v3094_v59, %v1721_v23  ;;  %v2607_v32 = vpop.f32.mrb[45].mxu1 }
0x11ab   :  { %v1724_v63 = vpop.f32.mrb[46].mxu1 }
0x11ac   :  { %v1727_v0 = vadd.f32 %v1722_v27, %v1679_v34  ;;  %v2608_v49 = vpop.f32.mrb[47].mxu1  ;;  %v2014_v27 = vld [vmem:[#allocation2 + $0xe] sm:$0x3]  ;;  %v1963_v34 = vld [vmem:[#allocation7 + $0x2] sm:$0x3] }
0x11ae   :  { %1728 = vst.msk [vmem:[#allocation7 + $0xa] sm:$0x3] %vm285_vm2, %v1727_v0 }
0x11b1   :  { %v1815_v2 = vpop.f32.mrb[48].mxu1  ;;  %v1771_v6 = vpop.f32.mrb[48].mxu0 }
0x11b2   :  { %v1821_v3 = vadd.f32 %v1815_v2, %v1780_v1  ;;  %v2623_v7 = vpop.f32.mrb[49].mxu1  ;;  %v1777_v50 = vadd.f32 %v1771_v6, %v1729_v5  ;;  %v2615_v8 = vpop.f32.mrb[49].mxu0  ;;  %v2080_v6 = vld [vmem:[#allocation3] sm:$0x3] }
0x11b3   :  { %v1818_v9 = vpop.f32.mrb[50].mxu1  ;;  %v1774_v10 = vpop.f32.mrb[50].mxu0 }
0x11b4   :  { %2800 = vtanh.f32 %v1821_v3  ;;  %v2624_v11 = vpop.f32.mrb[51].mxu1  ;;  %1778 = vst.msk [vmem:[#allocation7 + $0x4] sm:$0x3] %vm285_vm2, %v1777_v50  ;;  %v2616_v59 = vpop.f32.mrb[51].mxu0  ;;  %v2318_v20 = vmul.f32 -1.442695, %v1821_v3 }
0x11b9   :  { %v1882_v13 = vpop.f32.mrb[52].mxu0 }
0x11ba   :  { %v1888_v14 = vadd.f32 %v1882_v13, %v1847_v12  ;;  %v2631_v15 = vpop.f32.mrb[53].mxu0 }
0x11bb   :  { %v1885_v16 = vpop.f32.mrb[54].mxu0 }
0x11bc   :  { %2802 = vtanh.f32 %v1888_v14  ;;  %v2632_v17 = vpop.f32.mrb[55].mxu0  ;;  %v2320_v21 = vmul.f32 -1.442695, %v1888_v14 }
0x11bd   :  { %2804 = vpow2.f32 %v2318_v20 }
0x11be   :  { %v2801_v18 = vpop.eup %2800  ;;  %2806 = vpow2.f32 %v2320_v21 }
0x11bf   :  { %1831 = vrot.lane.b32.xlu0 %v2801_v18, %s2897_s2 }
0x11c6   :  { %v2803_v19 = vpop.eup %2802 }
0x11c7   :  { %1898 = vrot.lane.b32.xlu1 %v2803_v19, %s2897_s2  ;;  %v2805_v22 = vpop.eup %2804 }
0x11c8   :  { %v1825_v24 = vadd.f32 1.0, %v2805_v22  ;;  %v2807_v25 = vpop.eup %2806 }
0x11c9   :  { %v1892_v26 = vadd.f32 1.0, %v2807_v25 }
0x11ca   :  { %2808 = vrcp.f32 %v1825_v24 }
0x11cb   :  { %2810 = vrcp.f32 %v1892_v26 }
0x11d4   :  { %v2809_v28 = vpop.eup %2808 }
0x11d5   :  { %v2811_v31 = vpop.eup %2810  ;;  %v1829_v36 = vmul.f32 %v2809_v28, %v3312_v38 }
0x11d6   :  { %v1896_v40 = vmul.f32 %v2811_v31, %v3316_v45 }
0x1231   :  { %v1832_v29 = vpop.permute.xlu0 %1831 }
0x1232   :  { %v1834_v30 = vmul.f32 %v2809_v28, %v1832_v29 }
0x1234   :  { %1836 = vrot.lane.b32.xlu0 %v1834_v30, %s2898_s9 }
0x1239   :  { %v1899_v33 = vpop.permute.xlu1 %1898 }
0x123a   :  { %v1901_v35 = vmul.f32 %v2811_v31, %v1899_v33 }
0x123c   :  { %1903 = vrot.lane.b32.xlu1 %v1901_v35, %s2898_s9 }
0x12a6   :  { %v1837_v37 = vpop.permute.xlu0 %1836 }
0x12a7   :  { %v3379_v39 = vadd.f32 %v1837_v37, %v1829_v36 }
0x12a9   :  { %2812 = vtanh.f32 %v3379_v39 }
0x12ae   :  { %v1904_v52 = vpop.permute.xlu1 %1903 }
0x12af   :  { %v3383_v55 = vadd.f32 %v1904_v52, %v1896_v40 }
0x12b1   :  { %2814 = vtanh.f32 %v3383_v55 }
0x12b3   :  { %v2813_v43 = vpop.eup %2812 }
0x12b4   :  { %1842 = vrot.lane.b32.xlu0 %v2813_v43, %s2897_s2 }
0x12bb   :  { %v2815_v42 = vpop.eup %2814 }
0x12bc   :  { %1909 = vrot.lane.b32.xlu1 %v2815_v42, %s2897_s2 }
0x1326   :  { %v1843_v57 = vpop.permute.xlu0 %1842 }
0x1327   :  { %v1845_v38 = vmul.f32 %v2809_v28, %v1843_v57 }
0x1329   :  { %v1914_v53 = vpack.c.bf16 %v1845_v38, %v1845_v38 }
0x132b   :  { %1916 = vrot.lane.b32.xlu0 %v1914_v53, %s2898_s9 }
0x132e   :  { %v1910_v58 = vpop.permute.xlu1 %1909 }
0x132f   :  { %v1912_v48 = vmul.f32 %v2811_v31, %v1910_v58  ;;  %v2146_v58 = vld [vmem:[#allocation7 + $0xe] sm:$0x3] }
0x1331   :  { %v1964_v41 = vpack.c.bf16 %v1912_v48, %v1912_v48 }
0x1333   :  { %1966 = vrot.lane.b32.xlu1 %v1964_v41, %s2898_s9 }
0x139d   :  { %v1917_v45 = vpop.permute.xlu0 %1916 }
0x139e   :  { %2638 = vmatmul.mubr.msk.bf16.vlgmr.msra.gmra.mrb[52].mxu1 %vm324_vm3, %v1917_v45 }
0x139f   :  { %2650 = vmatpush3.bf16.msra.mxu1 %v3260_v51  ;;  %2653 = vmatprep.mubr.msk.bf16.mxu1 %vm2895_vm0, %v2894_v4 }
0x13a0   :  { %2651 = vmatprep.subr.bf16.mxu1 %v2894_v4 }
0x13a3   :  { %2652 = vmatpush3.bf16.msra.mxu1 %v3269_v61  ;;  %v3419_v61 = vld [vmem:[%s3460_s7] ss:$0 sm:$0xff]  ;;  %s2899_s7 = smov [#allocation7]  }
0x13a4   :  { %2665 = vmatprep.subr.bf16.mxu1 %v2894_v4 }
0x13a5   :  { %v1967_v44 = vpop.permute.xlu1 %1966 }
0x13a6   :  { %2654 = vmatmul.mubr.msk.bf16.vlgmr.msra.gmra.mrb[56].mxu1 %vm324_vm3, %v1917_v45  ;;  %2646 = vmatmul.mubr.msk.bf16.vlgmr.msra.gmra.mrb[56].mxu0 %vm324_vm3, %v1967_v44 }
0x13a7   :  { %2666 = vmatpush3.bf16.msra.mxu1 %v3335_v60  ;;  %2658 = vmatpush3.bf16.msra.mxu0 %v3279_v62  ;;  %v1913_v60 = vld [vmem:[#allocation7 + $0xc] sm:$0x3] }
0x13a8   :  { %2661 = vmatprep.mubr.msk.bf16.mxu0 %vm2895_vm0, %v2894_v4  ;;  %2659 = vmatprep.subr.bf16.mxu0 %v2894_v4 }
0x13a9   :  { %2667 = vmatprep.subr.bf16.mxu1 %v2894_v4  ;;  %2669 = vmatprep.mubr.msk.bf16.mxu1 %vm2895_vm0, %v2894_v4 }
0x13ab   :  { %2668 = vmatpush3.bf16.msra.mxu1 %v3348_v56  ;;  %2660 = vmatpush3.bf16.msra.mxu0 %v3292_v46 }
0x13ac   :  { %2673 = vmatprep.subr.bf16.mxu0 %v2894_v4 }
0x13ae   :  { %2662 = vmatmul.mubr.msk.bf16.vlgmr.msra.gmra.mrb[60].mxu0 %vm324_vm3, %v1967_v44  ;;  %v2196_v44 = vld [vmem:[#allocation7] sm:$0x3] }
0x13af   :  { %2674 = vmatpush3.bf16.msra.mxu0 %v3358_v54  ;;  %2677 = vmatprep.mubr.msk.bf16.mxu0 %vm2895_vm0, %v2894_v4 }
0x13b0   :  { %2675 = vmatprep.subr.bf16.mxu0 %v2894_v4 }
0x13b3   :  { %2676 = vmatpush3.bf16.msra.mxu0 %v3367_v47 }
0x1471   :  { %v1955_v51 = vpop.f32.mrb[52].mxu1 }
0x1472   :  { %v1956_v62 = vadd.f32 %v3419_v61, %v1955_v51  ;;  %v2639_v46 = vpop.f32.mrb[53].mxu1 }
0x1473   :  { %v1958_v56 = vpop.f32.mrb[54].mxu1 }
0x1474   :  { %v1961_v23 = vadd.f32 %v1956_v62, %v1913_v60  ;;  %v2640_v54 = vpop.f32.mrb[55].mxu1 }
0x1476   :  { %1962 = vst.msk [vmem:[#allocation7 + $0xc] sm:$0x3] %vm285_vm2, %v1961_v23 }
0x1479   :  { %v2049_v32 = vpop.f32.mrb[56].mxu1  ;;  %v2005_v47 = vpop.f32.mrb[56].mxu0 }
0x147a   :  { %v2055_v4 = vadd.f32 %v2049_v32, %v2014_v27  ;;  %v2655_v63 = vpop.f32.mrb[57].mxu1  ;;  %v2011_v0 = vadd.f32 %v2005_v47, %v1963_v34  ;;  %v2647_v49 = vpop.f32.mrb[57].mxu0 }
0x147b   :  { %v2052_v1 = vpop.f32.mrb[58].mxu1  ;;  %v2008_v2 = vpop.f32.mrb[58].mxu0 }
0x147c   :  { %2816 = vtanh.f32 %v2055_v4  ;;  %v2656_v3 = vpop.f32.mrb[59].mxu1  ;;  %2012 = vst.msk [vmem:[#allocation7 + $0x2] sm:$0x3] %vm285_vm2, %v2011_v0  ;;  %v2648_v5 = vpop.f32.mrb[59].mxu0  ;;  %v2324_v12 = vmul.f32 -1.442695, %v2055_v4 }
0x1481   :  { %v2115_v7 = vpop.f32.mrb[60].mxu0 }
0x1482   :  { %v2121_v50 = vadd.f32 %v2115_v7, %v2080_v6  ;;  %v2663_v8 = vpop.f32.mrb[61].mxu0 }
0x1483   :  { %v2118_v9 = vpop.f32.mrb[62].mxu0 }
0x1484   :  { %2818 = vtanh.f32 %v2121_v50  ;;  %v2664_v10 = vpop.f32.mrb[63].mxu0  ;;  %v2326_v13 = vmul.f32 -1.442695, %v2121_v50 }
0x1485   :  { %2820 = vpow2.f32 %v2324_v12 }
0x1486   :  { %v2817_v11 = vpop.eup %2816  ;;  %2822 = vpow2.f32 %v2326_v13 }
0x1487   :  { %2065 = vrot.lane.b32.xlu0 %v2817_v11, %s2897_s2 }
0x148e   :  { %v2819_v59 = vpop.eup %2818 }
0x148f   :  { %2131 = vrot.lane.b32.xlu1 %v2819_v59, %s2897_s2  ;;  %v2821_v14 = vpop.eup %2820 }
0x1490   :  { %v2059_v15 = vadd.f32 1.0, %v2821_v14  ;;  %v2823_v16 = vpop.eup %2822 }
0x1491   :  { %v2125_v17 = vadd.f32 1.0, %v2823_v16 }
0x1492   :  { %2824 = vrcp.f32 %v2059_v15 }
0x1493   :  { %2826 = vrcp.f32 %v2125_v17 }
0x149c   :  { %v2825_v18 = vpop.eup %2824 }
0x149d   :  { %v2827_v21 = vpop.eup %2826  ;;  %v2063_v25 = vmul.f32 %v2825_v18, %v3379_v39 }
0x149e   :  { %v2129_v29 = vmul.f32 %v2827_v21, %v3383_v55 }
0x14f9   :  { %v2066_v19 = vpop.permute.xlu0 %2065 }
0x14fa   :  { %v2068_v20 = vmul.f32 %v2825_v18, %v2066_v19 }
0x14fc   :  { %2070 = vrot.lane.b32.xlu0 %v2068_v20, %s2898_s9 }
0x1501   :  { %v2132_v22 = vpop.permute.xlu1 %2131 }
0x1502   :  { %v2134_v24 = vmul.f32 %v2827_v21, %v2132_v22 }
0x1504   :  { %2136 = vrot.lane.b32.xlu1 %v2134_v24, %s2898_s9 }
0x156e   :  { %v2071_v26 = vpop.permute.xlu0 %2070 }
0x156f   :  { %v2073_v28 = vadd.f32 %v2071_v26, %v2063_v25 }
0x1571   :  { %2828 = vtanh.f32 %v2073_v28 }
0x1576   :  { %v2137_v30 = vpop.permute.xlu1 %2136 }
0x1577   :  { %v2139_v31 = vadd.f32 %v2137_v30, %v2129_v29 }
0x1579   :  { %2830 = vtanh.f32 %v2139_v31 }
0x157b   :  { %v2829_v33 = vpop.eup %2828 }
0x157c   :  { %2076 = vrot.lane.b32.xlu0 %v2829_v33, %s2897_s2 }
0x1583   :  { %v2831_v35 = vpop.eup %2830 }
0x1584   :  { %2142 = vrot.lane.b32.xlu1 %v2831_v35, %s2897_s2  ;;  %s2251_s2 = sshll.u32 %s2899_s7, 4  ;;  %s2252_s2 = int_to_ptr.vmem [resolvable:$true] %s2251_s2 }
0x1585   :  { %s2863_s11 = scalar_lea.vmem %s2252_s2, 256  ;;  %p2868_p9 = scmp.lt.s32.totalorder %s2252_s2, %s2252_s2 }
0x1586   :  { %p2864_p8 = scmp.ne.s32.totalorder %s2252_s2, %s2863_s11  ;;  %p2869_p10 = scmp.lt.s32.totalorder %s2863_s11, %s2863_s11 }
0x1588   :  { %p2870_p11 = por %p2869_p10, %p2868_p9 }
0x158a   :  { %p2871_p12 = pnand %p2870_p11, %p2864_p8 }
0x15ee   :  { %v2077_v36 = vpop.permute.xlu0 %2076 }
0x15ef   :  { %v2079_v37 = vmul.f32 %v2825_v18, %v2077_v36 }
0x15f1   :  { %v2147_v40 = vpack.c.bf16 %v2079_v37, %v2079_v37 }
0x15f3   :  { %2149 = vrot.lane.b32.xlu0 %v2147_v40, %s2898_s9 }
0x15f6   :  { %v2143_v39 = vpop.permute.xlu1 %2142 }
0x15f7   :  { %v2145_v52 = vmul.f32 %v2827_v21, %v2143_v39 }
0x15f9   :  { %v2197_v43 = vpack.c.bf16 %v2145_v52, %v2145_v52 }
0x15fb   :  { %2199 = vrot.lane.b32.xlu1 %v2197_v43, %s2898_s9 }
0x1665   :  { %v2150_v55 = vpop.permute.xlu0 %2149 }
0x1666   :  { %2670 = vmatmul.mubr.msk.bf16.vlgmr.msra.gmra.mrb[60].mxu1 %vm324_vm3, %v2150_v55 }
0x166d   :  { %v2200_v42 = vpop.permute.xlu1 %2199 }
0x166e   :  { %2678 = vmatmul.mubr.msk.bf16.vlgmr.msra.gmra.mrb[64].mxu0 %vm324_vm3, %v2200_v42 }
0x1739   :  { %v2188_v57 = vpop.f32.mrb[60].mxu1 }
0x173a   :  { %v2189_v38 = vadd.f32 %v3419_v61, %v2188_v57  ;;  %v2671_v53 = vpop.f32.mrb[61].mxu1 }
0x173b   :  { %v2191_v48 = vpop.f32.mrb[62].mxu1 }
0x173c   :  { %v2194_v41 = vadd.f32 %v2189_v38, %v2146_v58  ;;  %v2672_v45 = vpop.f32.mrb[63].mxu1 }
0x173e   :  { %2195 = vst.msk [vmem:[#allocation7 + $0xe] sm:$0x3] %vm285_vm2, %v2194_v41 }
0x1741   :  { %v2238_v51 = vpop.f32.mrb[64].mxu0 }
0x1742   :  { %v2244_v62 = vadd.f32 %v2238_v51, %v2196_v44  ;;  %v2679_v46 = vpop.f32.mrb[65].mxu0 }
0x1743   :  { %v2241_v60 = vpop.f32.mrb[66].mxu0 }
0x1744   :  { %2245 = vst.msk [vmem:[#allocation7] sm:$0x3] %vm285_vm2, %v2244_v62  ;;  %v2680_v56 = vpop.f32.mrb[67].mxu0 }
0x1745   :  { %2874 = shalt.err (!%p2871_p12)
}
0x1746   :  { %s2875_s14 = scalar_lea.hbm %s3461_s8, 256 }
0x1747   :  { %p2876_p13 = scmp.ne.s32.totalorder %s3461_s8, %s2875_s14  ;;  %p2879_p0 = scmp.lt.u32.totalorder %s2875_s14, %s3461_s8 }
0x1749   :  { %p2881_p1 = pnand %p2879_p0, %p2876_p13 }
0x174b   :  { %2884 = shalt.err (!%p2881_p1)
}
0x174c   :  { %s2900_s19 = smov 2  }
0x174d   :  { %2257 = dma.vmem_to_hbm [thread:$0]  %s2252_s2, 256, %s3461_s8, [#allocation6], %s2898_s9, %s2898_s9, %s2900_s19  }
0x174e   :  { %2887 = dma.done.wait [#allocation6], 256  }
0x174f   :  { %2888 = vsyncadd [#allocation6], 4294967040 }
0x1750   :  { %2261 = vsyncpa [#allocation5], 1 }
0x1751   :  { %2262 = vsyncpa [#allocation6], 1 }

</bundles_post_ra>
